<compile_context>
chip_gen: v7x
topology: tpu7x:2x2x1
jax: 0.10.0
libtpu: 0.0.40
codegen_flags: <defaults>
</compile_context>

<pallas_src>
import jax
import jax.numpy as jnp
from jax.experimental import pallas as pl
from jax.experimental.pallas import tpu as pltpu


def _round_up(a, b):
    return (a + b - 1) // b * b


def span_kernel(x_ref, mask_ref, h0_ref,
                w1_ref, b1_ref, w2_ref, b2_ref,
                wih_ref, bih_ref, whh_ref, bhh_ref,
                out_ref,
                wy_s, m_s, l_s, acc_s):
    """Grid = (batch_blocks, pass, L_tiles); pass 0 = start logits + online-softmax ptr, pass 1 = end logits.

    Weight layouts (prepared in the wrapper; all boundaries lane-safe, no in-kernel gate slicing):
      w1, w2 : [H, X]; b1, b2 : [1, X]                      (BilinearSeqAttn linears, already transposed)
      wih    : [3, X, H]; bih : [3, 1, H]                   (GRUCell input weights, gate order r|z|n)
      whh    : [3, H, H]; bhh : [3, 1, H]                   (GRUCell hidden weights, gate order r|z|n)
    Scratch:
      wy_s  [TB, X]  : W1 h0 + b1 during pass 0, W2 h1 + b2 during pass 1
      m_s   [TB, 1]  : running softmax max      l_s [TB, 1] : running softmax denominator
      acc_s [TB, X]  : unnormalized softmax(start) @ x accumulator
    """
    p_id = pl.program_id(1)          # 0 = start pass, 1 = end pass
    l_id = pl.program_id(2)

    x_raw = x_ref[...]                                   # [TB, TL, X] in producer dtype (f32 or bf16)
    x = x_raw.astype(jnp.float32)                        # per-tile cast in-kernel (no wrapper-side copy)
    mask = mask_ref[...].astype(jnp.float32)             # [TB, TL], 1.0 = valid (reference formula)
    neg = (1.0 - mask) * -10000.0                        # [TB, TL]

    # ---- pass 0, first L tile: attention-1 query + online-softmax state init ----
    @pl.when(jnp.logical_and(p_id == 0, l_id == 0))
    def _():
        h0 = h0_ref[...].astype(jnp.float32)                                                   # [TB, H]
        wy_s[...] = jnp.dot(h0, w1_ref[...], preferred_element_type=jnp.float32) + b1_ref[...]  # [TB, X]
        m_s[...] = jnp.full(m_s.shape, -jnp.inf, dtype=m_s.dtype)
        l_s[...] = jnp.zeros(l_s.shape, dtype=l_s.dtype)
        acc_s[...] = jnp.zeros(acc_s.shape, dtype=acc_s.dtype)

    # ---- pass 0, every L tile: start logits (VPU) + online-softmax ptr accumulation (MXU) ----
    @pl.when(p_id == 0)
    def _():
        wy1 = wy_s[...]                                                   # [TB, X]
        s = jnp.sum(wy1[:, None, :] * x, axis=-1) + neg                   # [TB, TL] VPU mult + lane reduce
        out_ref[0] = s.astype(out_ref.dtype)                              # start-logit tile
        m_old = m_s[...]                                                  # [TB, 1]
        m_new = jnp.maximum(m_old, jnp.max(s, axis=-1, keepdims=True))
        a = jnp.exp(m_old - m_new)                                        # rescale factor (0 on first tile)
        e = jnp.exp(s - m_new)                                            # [TB, TL]
        l_s[...] = a * l_s[...] + jnp.sum(e, axis=-1, keepdims=True)
        acc_s[...] = a * acc_s[...] + jnp.einsum(
            'bkl,blx->bkx', e[:, None, :].astype(x_raw.dtype), x_raw,
            preferred_element_type=jnp.float32)[:, 0, :]                  # MXU, natural layout
        m_s[...] = m_new

    # ---- pass 1, first L tile: finalize ptr, run GRUCell, compute attention-2 query ----
    @pl.when(jnp.logical_and(p_id == 1, l_id == 0))
    def _():
        h0 = h0_ref[...].astype(jnp.float32)
        ptr = acc_s[...] / l_s[...]                                       # exact normalization (f32)
        gi_r = jnp.dot(ptr, wih_ref[0], preferred_element_type=jnp.float32) + bih_ref[0]
        gi_z = jnp.dot(ptr, wih_ref[1], preferred_element_type=jnp.float32) + bih_ref[1]
        gi_n = jnp.dot(ptr, wih_ref[2], preferred_element_type=jnp.float32) + bih_ref[2]
        gh_r = jnp.dot(h0, whh_ref[0], preferred_element_type=jnp.float32) + bhh_ref[0]
        gh_z = jnp.dot(h0, whh_ref[1], preferred_element_type=jnp.float32) + bhh_ref[1]
        gh_n = jnp.dot(h0, whh_ref[2], preferred_element_type=jnp.float32) + bhh_ref[2]
        r = jax.nn.sigmoid(gi_r + gh_r)
        z = jax.nn.sigmoid(gi_z + gh_z)
        n = jnp.tanh(gi_n + r * gh_n)
        h1 = (1.0 - z) * n + z * h0                                       # [TB, H]
        wy_s[...] = jnp.dot(h1, w2_ref[...], preferred_element_type=jnp.float32) + b2_ref[...]

    # ---- pass 1, every L tile: end logits (VPU) ----
    @pl.when(p_id == 1)
    def _():
        wy2 = wy_s[...]
        e2 = jnp.sum(wy2[:, None, :] * x, axis=-1) + neg
        out_ref[0] = e2.astype(out_ref.dtype)


def get_span_start_end(x, h0, x_mask, params, *, tl=256):
    """Returns (start_scores, end_scores), each [B, L] float32 raw masked logits (as in the reference)."""
    B, L, X = x.shape
    H = h0.shape[-1]

    # Lane-aligned L tile; pad L only when it is not already a multiple of the tile (no-op at prod L).
    tl = _round_up(min(tl, _round_up(L, 128)), 128)
    Lp = _round_up(L, tl)
    if Lp != L:
        x = jnp.pad(x, ((0, 0), (0, Lp - L), (0, 0)))
        x_mask = jnp.pad(x_mask, ((0, 0), (0, Lp - L)))        # pad = 0 -> -1e4 logit, ~0 softmax mass
    nl = Lp // tl

    # Batch tile: full B when small, else a sublane-aligned tile of 8 -> 'parallel' axis feeds both v7x TCs.
    tb = B if B <= 8 else (8 if B % 8 == 0 else B)
    nb = B // tb

    # VMEM budget derived from the actual tiles (double-buffered blocks + weights + scratch + VPU temp).
    need = (2 * (tb * tl * X * x.dtype.itemsize
                 + tb * tl * x_mask.dtype.itemsize
                 + tb * H * h0.dtype.itemsize
                 + tb * tl * 4)
            + 2 * (2 * (H * X + X) + 3 * (X * H + H) + 3 * (H * H + H)) * 4
            + (2 * tb * X + 2 * tb) * 4
            + tb * tl * X * 4)
    vmem_limit = int(min(64 * 2 ** 20, max(32 * 2 ** 20, 2 * need)))   # 64 MiB cap keeps v7x happy

    grid_spec = pltpu.PrefetchScalarGridSpec(
        num_scalar_prefetch=0,
        grid=(nb, 2, nl),
        in_specs=[
            pl.BlockSpec((tb, tl, X), lambda b, p, l: (b, l, 0)),     # x (streamed per L tile)
            pl.BlockSpec((tb, tl), lambda b, p, l: (b, l)),           # mask
            pl.BlockSpec((tb, H), lambda b, p, l: (b, 0)),            # h0
            pl.BlockSpec((H, X), lambda b, p, l: (0, 0)),             # w1
            pl.BlockSpec((1, X), lambda b, p, l: (0, 0)),             # b1
            pl.BlockSpec((H, X), lambda b, p, l: (0, 0)),             # w2
            pl.BlockSpec((1, X), lambda b, p, l: (0, 0)),             # b2
            pl.BlockSpec((3, X, H), lambda b, p, l: (0, 0, 0)),       # wih (per-gate)
            pl.BlockSpec((3, 1, H), lambda b, p, l: (0, 0, 0)),       # bih
            pl.BlockSpec((3, H, H), lambda b, p, l: (0, 0, 0)),       # whh (per-gate)
            pl.BlockSpec((3, 1, H), lambda b, p, l: (0, 0, 0)),       # bhh
        ],
        out_specs=pl.BlockSpec((1, tb, tl), lambda b, p, l: (p, b, l)),   # packed [2, B, Lp]
        scratch_shapes=[
            pltpu.VMEM((tb, X), jnp.float32),   # wy_s
            pltpu.VMEM((tb, 1), jnp.float32),   # m_s
            pltpu.VMEM((tb, 1), jnp.float32),   # l_s
            pltpu.VMEM((tb, X), jnp.float32),   # acc_s
        ],
    )

    packed = pl.pallas_call(
        span_kernel,
        out_shape=jax.ShapeDtypeStruct((2, B, Lp), jnp.float32),
        grid_spec=grid_spec,
        compiler_params=pltpu.CompilerParams(
            dimension_semantics=("parallel", "arbitrary", "arbitrary"),
            vmem_limit_bytes=vmem_limit),
    )(x, x_mask, h0,
      params["w1"], params["b1"], params["w2"], params["b2"],
      params["wih"], params["bih"], params["whh"], params["bhh"])

    start, end = packed[0], packed[1]
    if Lp != L:
        start, end = start[:, :L], end[:, :L]
    return start, end
    # TODO(synk): if the prod VMEM budget allows, stash pass-0 x tiles in a persistent VMEM scratch so
    #             pass 1 reads VMEM instead of making a second HBM pass over x.


def _reference(x, h0, x_mask, params):
    """Pure-JAX forward matching the PyTorch module at inference (dropout = identity)."""
    neg = (1.0 - x_mask) * -10000.0
    wy1 = h0 @ params["w1"] + params["b1"]
    start = jnp.einsum('blx,bx->bl', x, wy1) + neg
    p = jax.nn.softmax(start, axis=-1)
    ptr = jnp.einsum('bl,blx->bx', p, x)
    gi = jnp.einsum('bx,gxh->gbh', ptr, params["wih"]) + params["bih"]
    gh = jnp.einsum('bh,ghk->gbk', h0, params["whh"]) + params["bhh"]
    r = jax.nn.sigmoid(gi[0] + gh[0])
    z = jax.nn.sigmoid(gi[1] + gh[1])
    n = jnp.tanh(gi[2] + r * gh[2])
    h1 = (1.0 - z) * n + z * h0
    wy2 = h1 @ params["w2"] + params["b2"]
    end = jnp.einsum('blx,bx->bl', x, wy2) + neg
    return start, end


if __name__ == "__main__":
    B, L, X, H = 2, 8, 32, 32          # batch, seq len, x_size, h_size
    key = jax.random.PRNGKey(0)
    ks = jax.random.split(key, 12)

    x = jax.random.normal(ks[0], (B, L, X), jnp.float32)
    h0 = jax.random.normal(ks[1], (B, H), jnp.float32)
    # Reference computes `(1.0 - x_mask) * -10000.0`, i.e. x_mask == 1.0 -> valid token; keep that verbatim.
    x_mask = (jax.random.uniform(ks[2], (B, L)) > 0.2).astype(jnp.float32)

    s = 0.1  # deterministic small-scale synthetic weights (not a checkpoint)
    params = dict(
        w1=s * jax.random.normal(ks[3], (H, X), jnp.float32),        # attn.linear weight^T  (Linear(H->X))
        b1=s * jax.random.normal(ks[4], (1, X), jnp.float32),
        w2=s * jax.random.normal(ks[5], (H, X), jnp.float32),        # attn2.linear weight^T
        b2=s * jax.random.normal(ks[6], (1, X), jnp.float32),
        # GRUCell weights pre-split per gate (r|z|n). From torch: weight_ih.reshape(3,H,X).transpose(0,2,1).
        wih=s * jax.random.normal(ks[7], (3, X, H), jnp.float32),
        bih=s * jax.random.normal(ks[8], (3, 1, H), jnp.float32),
        whh=s * jax.random.normal(ks[9], (3, H, H), jnp.float32),
        bhh=s * jax.random.normal(ks[10], (3, 1, H), jnp.float32),
    )

    start_scores, end_scores = get_span_start_end(x, h0, x_mask, params)
    jax.block_until_ready((start_scores, end_scores))

    ref_start, ref_end = _reference(x, h0, x_mask, params)
    assert start_scores.shape == (B, L) and end_scores.shape == (B, L)
    assert bool(jnp.all(jnp.isfinite(start_scores))) and bool(jnp.all(jnp.isfinite(end_scores)))
    assert bool(jnp.allclose(start_scores, ref_start, rtol=1e-2, atol=1e-2)), \
        float(jnp.max(jnp.abs(start_scores - ref_start)))
    assert bool(jnp.allclose(end_scores, ref_end, rtol=1e-2, atol=1e-2)), \
        float(jnp.max(jnp.abs(end_scores - ref_end)))
    print("KERNEL_OK")
</pallas_src>

<mosaic_0001>
module attributes {stable_mosaic.version = 11 : i64} {
  func.func @span_kernel(%arg0: i32, %arg1: i32, %arg2: i32, %arg3: memref<2x128x32xf32, #tpu.memory_space<vmem>>, %arg4: memref<2x128xf32, #tpu.memory_space<vmem>>, %arg5: memref<2x32xf32, #tpu.memory_space<vmem>>, %arg6: memref<32x32xf32, #tpu.memory_space<vmem>>, %arg7: memref<1x32xf32, #tpu.memory_space<vmem>>, %arg8: memref<32x32xf32, #tpu.memory_space<vmem>>, %arg9: memref<1x32xf32, #tpu.memory_space<vmem>>, %arg10: memref<3x32x32xf32, #tpu.memory_space<vmem>>, %arg11: memref<3x1x32xf32, #tpu.memory_space<vmem>>, %arg12: memref<3x32x32xf32, #tpu.memory_space<vmem>>, %arg13: memref<3x1x32xf32, #tpu.memory_space<vmem>>, %arg14: memref<1x2x128xf32, #tpu.memory_space<vmem>>, %arg15: memref<2x32xf32, #tpu.memory_space<vmem>>, %arg16: memref<2x1xf32, #tpu.memory_space<vmem>>, %arg17: memref<2x1xf32, #tpu.memory_space<vmem>>, %arg18: memref<2x32xf32, #tpu.memory_space<vmem>>) attributes {dimension_semantics = [#tpu.dimension_semantics<parallel>, #tpu.dimension_semantics<arbitrary>, #tpu.dimension_semantics<arbitrary>], iteration_bounds = array<i64: 1, 2, 1>, scalar_prefetch = 0 : i64, scratch_operands = 4 : i64, tpu.core_type = #tpu.core_type<tc>, window_params = [{transform_indices = @transform_0, window_bounds = array<i64: 2, 128, 32>}, {transform_indices = @transform_1, window_bounds = array<i64: 2, 128>}, {transform_indices = @transform_2, window_bounds = array<i64: 2, 32>}, {pipeline_mode = #tpu.pipeline_mode<synchronous>, transform_indices = @transform_3, window_bounds = array<i64: 32, 32>}, {pipeline_mode = #tpu.pipeline_mode<synchronous>, transform_indices = @transform_4, window_bounds = array<i64: 1, 32>}, {pipeline_mode = #tpu.pipeline_mode<synchronous>, transform_indices = @transform_5, window_bounds = array<i64: 32, 32>}, {pipeline_mode = #tpu.pipeline_mode<synchronous>, transform_indices = @transform_6, window_bounds = array<i64: 1, 32>}, {pipeline_mode = #tpu.pipeline_mode<synchronous>, transform_indices = @transform_7, window_bounds = array<i64: 3, 32, 32>}, {pipeline_mode = #tpu.pipeline_mode<synchronous>, transform_indices = @transform_8, window_bounds = array<i64: 3, 1, 32>}, {pipeline_mode = #tpu.pipeline_mode<synchronous>, transform_indices = @transform_9, window_bounds = array<i64: 3, 32, 32>}, {pipeline_mode = #tpu.pipeline_mode<synchronous>, transform_indices = @transform_10, window_bounds = array<i64: 3, 1, 32>}, {transform_indices = @transform_11, window_bounds = array<i64: 1, 2, 128>}]} {
    %c0 = arith.constant 0 : index
    %c0_0 = arith.constant 0 : index
    %c0_1 = arith.constant 0 : index
    %0 = vector.load %arg3[%c0, %c0_0, %c0_1] : memref<2x128x32xf32, #tpu.memory_space<vmem>>, vector<2x128x32xf32>
    %c0_2 = arith.constant 0 : index
    %c0_3 = arith.constant 0 : index
    %1 = vector.load %arg4[%c0_2, %c0_3] : memref<2x128xf32, #tpu.memory_space<vmem>>, vector<2x128xf32>
    %cst = arith.constant 1.000000e+00 : f32
    %2 = vector.broadcast %cst : f32 to vector<2x128xf32>
    %3 = arith.subf %2, %1 : vector<2x128xf32>
    %cst_4 = arith.constant -1.000000e+04 : f32
    %4 = vector.broadcast %cst_4 : f32 to vector<2x128xf32>
    %5 = arith.mulf %3, %4 : vector<2x128xf32>
    %c0_i32 = arith.constant 0 : i32
    %6 = arith.cmpi eq, %arg1, %c0_i32 : i32
    %c0_i32_5 = arith.constant 0 : i32
    %7 = arith.cmpi eq, %arg2, %c0_i32_5 : i32
    %8 = arith.andi %6, %7 : i1
    %9 = arith.extui %8 : i1 to i32
    %c0_i32_6 = arith.constant 0 : i32
    %10 = arith.cmpi ne, %9, %c0_i32_6 : i32
    scf.if %10 {
      %c0_13 = arith.constant 0 : index
      %c0_14 = arith.constant 0 : index
      %22 = vector.load %arg5[%c0_13, %c0_14] : memref<2x32xf32, #tpu.memory_space<vmem>>, vector<2x32xf32>
      %c0_15 = arith.constant 0 : index
      %c0_16 = arith.constant 0 : index
      %23 = vector.load %arg6[%c0_15, %c0_16] : memref<32x32xf32, #tpu.memory_space<vmem>>, vector<32x32xf32>
      %cst_17 = arith.constant dense<0.000000e+00> : vector<2x32xf32>
      %24 = tpu.matmul %22, %23, %cst_17 {dimension_numbers = #tpu.dot_dimension_numbers<[1], [0], [0], [1], [0, 0, 1, 1], [], []>} : vector<2x32xf32>, vector<32x32xf32>, vector<2x32xf32> -> vector<2x32xf32>
      %c0_18 = arith.constant 0 : index
      %c0_19 = arith.constant 0 : index
      %25 = vector.load %arg7[%c0_18, %c0_19] : memref<1x32xf32, #tpu.memory_space<vmem>>, vector<1x32xf32>
      %26 = vector.broadcast %25 : vector<1x32xf32> to vector<2x32xf32>
      %27 = arith.addf %24, %26 : vector<2x32xf32>
      %c0_20 = arith.constant 0 : index
      %c0_21 = arith.constant 0 : index
      %28 = vector.load %arg15[%c0_20, %c0_21] : memref<2x32xf32, #tpu.memory_space<vmem>>, vector<2x32xf32>
      tpu.vector_store %arg15[%c0_20, %c0_21], %27 {strides = array<i32>} : memref<2x32xf32, #tpu.memory_space<vmem>>, vector<2x32xf32>,
      %cst_22 = arith.constant 0xFF800000 : f32
      %29 = vector.broadcast %cst_22 : f32 to vector<2x1xf32>
      %c0_23 = arith.constant 0 : index
      %c0_24 = arith.constant 0 : index
      %30 = vector.load %arg16[%c0_23, %c0_24] : memref<2x1xf32, #tpu.memory_space<vmem>>, vector<2x1xf32>
      tpu.vector_store %arg16[%c0_23, %c0_24], %29 {strides = array<i32>} : memref<2x1xf32, #tpu.memory_space<vmem>>, vector<2x1xf32>,
      %cst_25 = arith.constant 0.000000e+00 : f32
      %31 = vector.broadcast %cst_25 : f32 to vector<2x1xf32>
      %c0_26 = arith.constant 0 : index
      %c0_27 = arith.constant 0 : index
      %32 = vector.load %arg17[%c0_26, %c0_27] : memref<2x1xf32, #tpu.memory_space<vmem>>, vector<2x1xf32>
      tpu.vector_store %arg17[%c0_26, %c0_27], %31 {strides = array<i32>} : memref<2x1xf32, #tpu.memory_space<vmem>>, vector<2x1xf32>,
      %cst_28 = arith.constant 0.000000e+00 : f32
      %33 = vector.broadcast %cst_28 : f32 to vector<2x32xf32>
      %c0_29 = arith.constant 0 : index
      %c0_30 = arith.constant 0 : index
      %34 = vector.load %arg18[%c0_29, %c0_30] : memref<2x32xf32, #tpu.memory_space<vmem>>, vector<2x32xf32>
      tpu.vector_store %arg18[%c0_29, %c0_30], %33 {strides = array<i32>} : memref<2x32xf32, #tpu.memory_space<vmem>>, vector<2x32xf32>,
    } else {
    }
    %c0_i32_7 = arith.constant 0 : i32
    %11 = arith.cmpi eq, %arg1, %c0_i32_7 : i32
    %12 = arith.extui %11 : i1 to i32
    %c0_i32_8 = arith.constant 0 : i32
    %13 = arith.cmpi ne, %12, %c0_i32_8 : i32
    scf.if %13 {
      %c0_13 = arith.constant 0 : index
      %c0_14 = arith.constant 0 : index
      %22 = vector.load %arg15[%c0_13, %c0_14] : memref<2x32xf32, #tpu.memory_space<vmem>>, vector<2x32xf32>
      %23 = vector.shape_cast %22 : vector<2x32xf32> to vector<2x1x32xf32>
      %24 = vector.broadcast %23 : vector<2x1x32xf32> to vector<2x128x32xf32>
      %25 = arith.mulf %24, %0 : vector<2x128x32xf32>
      %cst_15 = arith.constant dense<0.000000e+00> : vector<2x128xf32>
      %26 = vector.multi_reduction <add>, %25, %cst_15 [2] : vector<2x128x32xf32> to vector<2x128xf32>
      %27 = arith.addf %26, %5 : vector<2x128xf32>
      %c0_16 = arith.constant 0 : index
      %c0_17 = arith.constant 0 : index
      %c0_18 = arith.constant 0 : index
      %28 = vector.load %arg14[%c0_16, %c0_17, %c0_18] : memref<1x2x128xf32, #tpu.memory_space<vmem>>, vector<1x2x128xf32>
      %29 = vector.shape_cast %28 : vector<1x2x128xf32> to vector<2x128xf32>
      %30 = vector.shape_cast %27 : vector<2x128xf32> to vector<1x2x128xf32>
      tpu.vector_store %arg14[%c0_16, %c0_17, %c0_18], %30 {strides = array<i32>} : memref<1x2x128xf32, #tpu.memory_space<vmem>>, vector<1x2x128xf32>,
      %c0_19 = arith.constant 0 : index
      %c0_20 = arith.constant 0 : index
      %31 = vector.load %arg16[%c0_19, %c0_20] : memref<2x1xf32, #tpu.memory_space<vmem>>, vector<2x1xf32>
      %cst_21 = arith.constant dense<0xFF800000> : vector<2xf32>
      %32 = vector.multi_reduction <maximumf>, %27, %cst_21 [1] : vector<2x128xf32> to vector<2xf32>
      %33 = vector.shape_cast %32 : vector<2xf32> to vector<2x1xf32>
      %34 = arith.maximumf %31, %33 : vector<2x1xf32>
      %35 = arith.subf %31, %34 : vector<2x1xf32>
      %36 = math.exp %35 : vector<2x1xf32>
      %37 = vector.broadcast %34 : vector<2x1xf32> to vector<2x128xf32>
      %38 = arith.subf %27, %37 : vector<2x128xf32>
      %39 = math.exp %38 : vector<2x128xf32>
      %c0_22 = arith.constant 0 : index
      %c0_23 = arith.constant 0 : index
      %40 = vector.load %arg17[%c0_22, %c0_23] : memref<2x1xf32, #tpu.memory_space<vmem>>, vector<2x1xf32>
      %41 = arith.mulf %36, %40 : vector<2x1xf32>
      %cst_24 = arith.constant dense<0.000000e+00> : vector<2xf32>
      %42 = vector.multi_reduction <add>, %39, %cst_24 [1] : vector<2x128xf32> to vector<2xf32>
      %43 = vector.shape_cast %42 : vector<2xf32> to vector<2x1xf32>
      %44 = arith.addf %41, %43 : vector<2x1xf32>
      %c0_25 = arith.constant 0 : index
      %c0_26 = arith.constant 0 : index
      %45 = vector.load %arg17[%c0_25, %c0_26] : memref<2x1xf32, #tpu.memory_space<vmem>>, vector<2x1xf32>
      tpu.vector_store %arg17[%c0_25, %c0_26], %44 {strides = array<i32>} : memref<2x1xf32, #tpu.memory_space<vmem>>, vector<2x1xf32>,
      %c0_27 = arith.constant 0 : index
      %c0_28 = arith.constant 0 : index
      %46 = vector.load %arg18[%c0_27, %c0_28] : memref<2x32xf32, #tpu.memory_space<vmem>>, vector<2x32xf32>
      %47 = vector.broadcast %36 : vector<2x1xf32> to vector<2x32xf32>
      %48 = arith.mulf %47, %46 : vector<2x32xf32>
      %49 = vector.shape_cast %39 : vector<2x128xf32> to vector<2x1x128xf32>
      "tpu.trace_start"() <{level = 10 : i32, message = "bkl,blx->bkx"}> : () -> ()
      %cst_29 = arith.constant dense<0.000000e+00> : vector<2x1x32xf32>
      %50 = tpu.matmul %49, %0, %cst_29 {dimension_numbers = #tpu.dot_dimension_numbers<[2], [1], [1], [2], [0, 0, 0, 1, 1, 2], [0], [0]>} : vector<2x1x128xf32>, vector<2x128x32xf32>, vector<2x1x32xf32> -> vector<2x1x32xf32>
      "tpu.trace_stop"() : () -> ()
      %51 = vector.shape_cast %50 : vector<2x1x32xf32> to vector<2x32xf32>
      %52 = arith.addf %48, %51 : vector<2x32xf32>
      %c0_30 = arith.constant 0 : index
      %c0_31 = arith.constant 0 : index
      %53 = vector.load %arg18[%c0_30, %c0_31] : memref<2x32xf32, #tpu.memory_space<vmem>>, vector<2x32xf32>
      tpu.vector_store %arg18[%c0_30, %c0_31], %52 {strides = array<i32>} : memref<2x32xf32, #tpu.memory_space<vmem>>, vector<2x32xf32>,
      %c0_32 = arith.constant 0 : index
      %c0_33 = arith.constant 0 : index
      %54 = vector.load %arg16[%c0_32, %c0_33] : memref<2x1xf32, #tpu.memory_space<vmem>>, vector<2x1xf32>
      tpu.vector_store %arg16[%c0_32, %c0_33], %34 {strides = array<i32>} : memref<2x1xf32, #tpu.memory_space<vmem>>, vector<2x1xf32>,
    } else {
    }
    %c1_i32 = arith.constant 1 : i32
    %14 = arith.cmpi eq, %arg1, %c1_i32 : i32
    %c0_i32_9 = arith.constant 0 : i32
    %15 = arith.cmpi eq, %arg2, %c0_i32_9 : i32
    %16 = arith.andi %14, %15 : i1
    %17 = arith.extui %16 : i1 to i32
    %c0_i32_10 = arith.constant 0 : i32
    %18 = arith.cmpi ne, %17, %c0_i32_10 : i32
    scf.if %18 {
      %c0_13 = arith.constant 0 : index
      %c0_14 = arith.constant 0 : index
      %22 = vector.load %arg5[%c0_13, %c0_14] : memref<2x32xf32, #tpu.memory_space<vmem>>, vector<2x32xf32>
      %c0_15 = arith.constant 0 : index
      %c0_16 = arith.constant 0 : index
      %23 = vector.load %arg18[%c0_15, %c0_16] : memref<2x32xf32, #tpu.memory_space<vmem>>, vector<2x32xf32>
      %c0_17 = arith.constant 0 : index
      %c0_18 = arith.constant 0 : index
      %24 = vector.load %arg17[%c0_17, %c0_18] : memref<2x1xf32, #tpu.memory_space<vmem>>, vector<2x1xf32>
      %25 = vector.broadcast %24 : vector<2x1xf32> to vector<2x32xf32>
      %26 = arith.divf %23, %25 : vector<2x32xf32>
      %c0_19 = arith.constant 0 : index
      %c0_20 = arith.constant 0 : index
      %c0_21 = arith.constant 0 : index
      %27 = vector.load %arg10[%c0_19, %c0_20, %c0_21] : memref<3x32x32xf32, #tpu.memory_space<vmem>>, vector<1x32x32xf32>
      %28 = vector.shape_cast %27 : vector<1x32x32xf32> to vector<32x32xf32>
      %cst_22 = arith.constant dense<0.000000e+00> : vector<2x32xf32>
      %29 = tpu.matmul %26, %28, %cst_22 {dimension_numbers = #tpu.dot_dimension_numbers<[1], [0], [0], [1], [0, 0, 1, 1], [], []>} : vector<2x32xf32>, vector<32x32xf32>, vector<2x32xf32> -> vector<2x32xf32>
      %c0_23 = arith.constant 0 : index
      %c0_24 = arith.constant 0 : index
      %c0_25 = arith.constant 0 : index
      %30 = vector.load %arg11[%c0_23, %c0_24, %c0_25] : memref<3x1x32xf32, #tpu.memory_space<vmem>>, vector<1x1x32xf32>
      %31 = vector.shape_cast %30 : vector<1x1x32xf32> to vector<1x32xf32>
      %32 = vector.broadcast %31 : vector<1x32xf32> to vector<2x32xf32>
      %33 = arith.addf %29, %32 : vector<2x32xf32>
      %c1 = arith.constant 1 : index
      %c0_26 = arith.constant 0 : index
      %c0_27 = arith.constant 0 : index
      %34 = vector.load %arg10[%c1, %c0_26, %c0_27] : memref<3x32x32xf32, #tpu.memory_space<vmem>>, vector<1x32x32xf32>
      %35 = vector.shape_cast %34 : vector<1x32x32xf32> to vector<32x32xf32>
      %cst_28 = arith.constant dense<0.000000e+00> : vector<2x32xf32>
      %36 = tpu.matmul %26, %35, %cst_28 {dimension_numbers = #tpu.dot_dimension_numbers<[1], [0], [0], [1], [0, 0, 1, 1], [], []>} : vector<2x32xf32>, vector<32x32xf32>, vector<2x32xf32> -> vector<2x32xf32>
      %c1_29 = arith.constant 1 : index
      %c0_30 = arith.constant 0 : index
      %c0_31 = arith.constant 0 : index
      %37 = vector.load %arg11[%c1_29, %c0_30, %c0_31] : memref<3x1x32xf32, #tpu.memory_space<vmem>>, vector<1x1x32xf32>
      %38 = vector.shape_cast %37 : vector<1x1x32xf32> to vector<1x32xf32>
      %39 = vector.broadcast %38 : vector<1x32xf32> to vector<2x32xf32>
      %40 = arith.addf %36, %39 : vector<2x32xf32>
      %c2 = arith.constant 2 : index
      %c0_32 = arith.constant 0 : index
      %c0_33 = arith.constant 0 : index
      %41 = vector.load %arg10[%c2, %c0_32, %c0_33] : memref<3x32x32xf32, #tpu.memory_space<vmem>>, vector<1x32x32xf32>
      %42 = vector.shape_cast %41 : vector<1x32x32xf32> to vector<32x32xf32>
      %cst_34 = arith.constant dense<0.000000e+00> : vector<2x32xf32>
      %43 = tpu.matmul %26, %42, %cst_34 {dimension_numbers = #tpu.dot_dimension_numbers<[1], [0], [0], [1], [0, 0, 1, 1], [], []>} : vector<2x32xf32>, vector<32x32xf32>, vector<2x32xf32> -> vector<2x32xf32>
      %c2_35 = arith.constant 2 : index
      %c0_36 = arith.constant 0 : index
      %c0_37 = arith.constant 0 : index
      %44 = vector.load %arg11[%c2_35, %c0_36, %c0_37] : memref<3x1x32xf32, #tpu.memory_space<vmem>>, vector<1x1x32xf32>
      %45 = vector.shape_cast %44 : vector<1x1x32xf32> to vector<1x32xf32>
      %46 = vector.broadcast %45 : vector<1x32xf32> to vector<2x32xf32>
      %47 = arith.addf %43, %46 : vector<2x32xf32>
      %c0_38 = arith.constant 0 : index
      %c0_39 = arith.constant 0 : index
      %c0_40 = arith.constant 0 : index
      %48 = vector.load %arg12[%c0_38, %c0_39, %c0_40] : memref<3x32x32xf32, #tpu.memory_space<vmem>>, vector<1x32x32xf32>
      %49 = vector.shape_cast %48 : vector<1x32x32xf32> to vector<32x32xf32>
      %cst_41 = arith.constant dense<0.000000e+00> : vector<2x32xf32>
      %50 = tpu.matmul %22, %49, %cst_41 {dimension_numbers = #tpu.dot_dimension_numbers<[1], [0], [0], [1], [0, 0, 1, 1], [], []>} : vector<2x32xf32>, vector<32x32xf32>, vector<2x32xf32> -> vector<2x32xf32>
      %c0_42 = arith.constant 0 : index
      %c0_43 = arith.constant 0 : index
      %c0_44 = arith.constant 0 : index
      %51 = vector.load %arg13[%c0_42, %c0_43, %c0_44] : memref<3x1x32xf32, #tpu.memory_space<vmem>>, vector<1x1x32xf32>
      %52 = vector.shape_cast %51 : vector<1x1x32xf32> to vector<1x32xf32>
      %53 = vector.broadcast %52 : vector<1x32xf32> to vector<2x32xf32>
      %54 = arith.addf %50, %53 : vector<2x32xf32>
      %c1_45 = arith.constant 1 : index
      %c0_46 = arith.constant 0 : index
      %c0_47 = arith.constant 0 : index
      %55 = vector.load %arg12[%c1_45, %c0_46, %c0_47] : memref<3x32x32xf32, #tpu.memory_space<vmem>>, vector<1x32x32xf32>
      %56 = vector.shape_cast %55 : vector<1x32x32xf32> to vector<32x32xf32>
      %cst_48 = arith.constant dense<0.000000e+00> : vector<2x32xf32>
      %57 = tpu.matmul %22, %56, %cst_48 {dimension_numbers = #tpu.dot_dimension_numbers<[1], [0], [0], [1], [0, 0, 1, 1], [], []>} : vector<2x32xf32>, vector<32x32xf32>, vector<2x32xf32> -> vector<2x32xf32>
      %c1_49 = arith.constant 1 : index
      %c0_50 = arith.constant 0 : index
      %c0_51 = arith.constant 0 : index
      %58 = vector.load %arg13[%c1_49, %c0_50, %c0_51] : memref<3x1x32xf32, #tpu.memory_space<vmem>>, vector<1x1x32xf32>
      %59 = vector.shape_cast %58 : vector<1x1x32xf32> to vector<1x32xf32>
      %60 = vector.broadcast %59 : vector<1x32xf32> to vector<2x32xf32>
      %61 = arith.addf %57, %60 : vector<2x32xf32>
      %c2_52 = arith.constant 2 : index
      %c0_53 = arith.constant 0 : index
      %c0_54 = arith.constant 0 : index
      %62 = vector.load %arg12[%c2_52, %c0_53, %c0_54] : memref<3x32x32xf32, #tpu.memory_space<vmem>>, vector<1x32x32xf32>
      %63 = vector.shape_cast %62 : vector<1x32x32xf32> to vector<32x32xf32>
      %cst_55 = arith.constant dense<0.000000e+00> : vector<2x32xf32>
      %64 = tpu.matmul %22, %63, %cst_55 {dimension_numbers = #tpu.dot_dimension_numbers<[1], [0], [0], [1], [0, 0, 1, 1], [], []>} : vector<2x32xf32>, vector<32x32xf32>, vector<2x32xf32> -> vector<2x32xf32>
      %c2_56 = arith.constant 2 : index
      %c0_57 = arith.constant 0 : index
      %c0_58 = arith.constant 0 : index
      %65 = vector.load %arg13[%c2_56, %c0_57, %c0_58] : memref<3x1x32xf32, #tpu.memory_space<vmem>>, vector<1x1x32xf32>
      %66 = vector.shape_cast %65 : vector<1x1x32xf32> to vector<1x32xf32>
      %67 = vector.broadcast %66 : vector<1x32xf32> to vector<2x32xf32>
      %68 = arith.addf %64, %67 : vector<2x32xf32>
      %69 = arith.addf %33, %54 : vector<2x32xf32>
      %70 = arith.negf %69 : vector<2x32xf32>
      %71 = math.exp %70 : vector<2x32xf32>
      %cst_59 = arith.constant 1.000000e+00 : f32
      %72 = vector.broadcast %cst_59 : f32 to vector<2x32xf32>
      %73 = arith.addf %72, %71 : vector<2x32xf32>
      %74 = arith.divf %72, %73 : vector<2x32xf32>
      %75 = arith.addf %40, %61 : vector<2x32xf32>
      %76 = arith.negf %75 : vector<2x32xf32>
      %77 = math.exp %76 : vector<2x32xf32>
      %cst_60 = arith.constant 1.000000e+00 : f32
      %78 = vector.broadcast %cst_60 : f32 to vector<2x32xf32>
      %79 = arith.addf %78, %77 : vector<2x32xf32>
      %80 = arith.divf %78, %79 : vector<2x32xf32>
      %81 = arith.mulf %74, %68 : vector<2x32xf32>
      %82 = arith.addf %47, %81 : vector<2x32xf32>
      %83 = math.tanh %82 : vector<2x32xf32>
      %cst_61 = arith.constant 1.000000e+00 : f32
      %84 = vector.broadcast %cst_61 : f32 to vector<2x32xf32>
      %85 = arith.subf %84, %80 : vector<2x32xf32>
      %86 = arith.mulf %85, %83 : vector<2x32xf32>
      %87 = arith.mulf %80, %22 : vector<2x32xf32>
      %88 = arith.addf %86, %87 : vector<2x32xf32>
      %c0_62 = arith.constant 0 : index
      %c0_63 = arith.constant 0 : index
      %89 = vector.load %arg8[%c0_62, %c0_63] : memref<32x32xf32, #tpu.memory_space<vmem>>, vector<32x32xf32>
      %cst_64 = arith.constant dense<0.000000e+00> : vector<2x32xf32>
      %90 = tpu.matmul %88, %89, %cst_64 {dimension_numbers = #tpu.dot_dimension_numbers<[1], [0], [0], [1], [0, 0, 1, 1], [], []>} : vector<2x32xf32>, vector<32x32xf32>, vector<2x32xf32> -> vector<2x32xf32>
      %c0_65 = arith.constant 0 : index
      %c0_66 = arith.constant 0 : index
      %91 = vector.load %arg9[%c0_65, %c0_66] : memref<1x32xf32, #tpu.memory_space<vmem>>, vector<1x32xf32>
      %92 = vector.broadcast %91 : vector<1x32xf32> to vector<2x32xf32>
      %93 = arith.addf %90, %92 : vector<2x32xf32>
      %c0_67 = arith.constant 0 : index
      %c0_68 = arith.constant 0 : index
      %94 = vector.load %arg15[%c0_67, %c0_68] : memref<2x32xf32, #tpu.memory_space<vmem>>, vector<2x32xf32>
      tpu.vector_store %arg15[%c0_67, %c0_68], %93 {strides = array<i32>} : memref<2x32xf32, #tpu.memory_space<vmem>>, vector<2x32xf32>,
    } else {
    }
    %c1_i32_11 = arith.constant 1 : i32
    %19 = arith.cmpi eq, %arg1, %c1_i32_11 : i32
    %20 = arith.extui %19 : i1 to i32
    %c0_i32_12 = arith.constant 0 : i32
    %21 = arith.cmpi ne, %20, %c0_i32_12 : i32
    scf.if %21 {
      %c0_13 = arith.constant 0 : index
      %c0_14 = arith.constant 0 : index
      %22 = vector.load %arg15[%c0_13, %c0_14] : memref<2x32xf32, #tpu.memory_space<vmem>>, vector<2x32xf32>
      %23 = vector.shape_cast %22 : vector<2x32xf32> to vector<2x1x32xf32>
      %24 = vector.broadcast %23 : vector<2x1x32xf32> to vector<2x128x32xf32>
      %25 = arith.mulf %24, %0 : vector<2x128x32xf32>
      %cst_15 = arith.constant dense<0.000000e+00> : vector<2x128xf32>
      %26 = vector.multi_reduction <add>, %25, %cst_15 [2] : vector<2x128x32xf32> to vector<2x128xf32>
      %27 = arith.addf %26, %5 : vector<2x128xf32>
      %c0_16 = arith.constant 0 : index
      %c0_17 = arith.constant 0 : index
      %c0_18 = arith.constant 0 : index
      %28 = vector.load %arg14[%c0_16, %c0_17, %c0_18] : memref<1x2x128xf32, #tpu.memory_space<vmem>>, vector<1x2x128xf32>
      %29 = vector.shape_cast %28 : vector<1x2x128xf32> to vector<2x128xf32>
      %30 = vector.shape_cast %27 : vector<2x128xf32> to vector<1x2x128xf32>
      tpu.vector_store %arg14[%c0_16, %c0_17, %c0_18], %30 {strides = array<i32>} : memref<1x2x128xf32, #tpu.memory_space<vmem>>, vector<1x2x128xf32>,
    } else {
    }
    return
  }
  func.func @transform_0(%arg0: i32, %arg1: i32, %arg2: i32) -> (i32, i32, i32) {
    %c0_i32 = arith.constant 0 : i32
    %c0_i32_0 = arith.constant 0 : i32
    return %arg0, %arg2, %c0_i32 : i32, i32, i32
  }
  func.func @transform_1(%arg0: i32, %arg1: i32, %arg2: i32) -> (i32, i32) {
    %c0_i32 = arith.constant 0 : i32
    return %arg0, %arg2 : i32, i32
  }
  func.func @transform_2(%arg0: i32, %arg1: i32, %arg2: i32) -> (i32, i32) {
    %c0_i32 = arith.constant 0 : i32
    %c0_i32_0 = arith.constant 0 : i32
    return %arg0, %c0_i32 : i32, i32
  }
  func.func @transform_3(%arg0: i32, %arg1: i32, %arg2: i32) -> (i32, i32) {
    %c0_i32 = arith.constant 0 : i32
    %c0_i32_0 = arith.constant 0 : i32
    %c0_i32_1 = arith.constant 0 : i32
    return %c0_i32, %c0_i32_0 : i32, i32
  }
  func.func @transform_4(%arg0: i32, %arg1: i32, %arg2: i32) -> (i32, i32) {
    %c0_i32 = arith.constant 0 : i32
    %c0_i32_0 = arith.constant 0 : i32
    %c0_i32_1 = arith.constant 0 : i32
    return %c0_i32, %c0_i32_0 : i32, i32
  }
  func.func @transform_5(%arg0: i32, %arg1: i32, %arg2: i32) -> (i32, i32) {
    %c0_i32 = arith.constant 0 : i32
    %c0_i32_0 = arith.constant 0 : i32
    %c0_i32_1 = arith.constant 0 : i32
    return %c0_i32, %c0_i32_0 : i32, i32
  }
  func.func @transform_6(%arg0: i32, %arg1: i32, %arg2: i32) -> (i32, i32) {
    %c0_i32 = arith.constant 0 : i32
    %c0_i32_0 = arith.constant 0 : i32
    %c0_i32_1 = arith.constant 0 : i32
    return %c0_i32, %c0_i32_0 : i32, i32
  }
  func.func @transform_7(%arg0: i32, %arg1: i32, %arg2: i32) -> (i32, i32, i32) {
    %c0_i32 = arith.constant 0 : i32
    %c0_i32_0 = arith.constant 0 : i32
    %c0_i32_1 = arith.constant 0 : i32
    %c0_i32_2 = arith.constant 0 : i32
    return %c0_i32, %c0_i32_0, %c0_i32_1 : i32, i32, i32
  }
  func.func @transform_8(%arg0: i32, %arg1: i32, %arg2: i32) -> (i32, i32, i32) {
    %c0_i32 = arith.constant 0 : i32
    %c0_i32_0 = arith.constant 0 : i32
    %c0_i32_1 = arith.constant 0 : i32
    %c0_i32_2 = arith.constant 0 : i32
    return %c0_i32, %c0_i32_0, %c0_i32_1 : i32, i32, i32
  }
  func.func @transform_9(%arg0: i32, %arg1: i32, %arg2: i32) -> (i32, i32, i32) {
    %c0_i32 = arith.constant 0 : i32
    %c0_i32_0 = arith.constant 0 : i32
    %c0_i32_1 = arith.constant 0 : i32
    %c0_i32_2 = arith.constant 0 : i32
    return %c0_i32, %c0_i32_0, %c0_i32_1 : i32, i32, i32
  }
  func.func @transform_10(%arg0: i32, %arg1: i32, %arg2: i32) -> (i32, i32, i32) {
    %c0_i32 = arith.constant 0 : i32
    %c0_i32_0 = arith.constant 0 : i32
    %c0_i32_1 = arith.constant 0 : i32
    %c0_i32_2 = arith.constant 0 : i32
    return %c0_i32, %c0_i32_0, %c0_i32_1 : i32, i32, i32
  }
  func.func @transform_11(%arg0: i32, %arg1: i32, %arg2: i32) -> (i32, i32, i32) {
    %c0_i32 = arith.constant 0 : i32
    return %arg1, %arg0, %arg2 : i32, i32, i32
  }
}

</mosaic_0001>

<bundles_post_ra>
// kernel: tpu_custom_call.1
= control target key start
LH: loop header
LB: loop body
LE: loop exit
PB: predicated region body
PF: predicated region fallthrough
CT: control target
= control target key end

     0   :  { %s5332_s0 = inlined_call_operand.vmem [shape: f32[2,128,32], index: 0, kind: input, shape index: {}]   ;;  %s5333_s1 = inlined_call_operand.vmem [shape: f32[2,128], index: 1, kind: input, shape index: {}]   ;;  %s5334_s2 = inlined_call_operand.vmem [shape: f32[2,32], index: 2, kind: input, shape index: {}]   ;;  %s5335_s3 = inlined_call_operand.vmem [shape: f32[32,32], index: 3, kind: input, shape index: {}]   ;;  %s5336_s4 = inlined_call_operand.vmem [shape: f32[1,32], index: 4, kind: input, shape index: {}]   ;;  %s5337_s5 = inlined_call_operand.vmem [shape: f32[32,32], index: 5, kind: input, shape index: {}]   ;;  %s5338_s6 = inlined_call_operand.vmem [shape: f32[1,32], index: 6, kind: input, shape index: {}]   ;;  %s5339_s7 = inlined_call_operand.vmem [shape: f32[3,32,32], index: 7, kind: input, shape index: {}]   ;;  %s5340_s8 = inlined_call_operand.vmem [shape: f32[3,1,32], index: 8, kind: input, shape index: {}]   ;;  %s5341_s9 = inlined_call_operand.vmem [shape: f32[3,32,32], index: 9, kind: input, shape index: {}]   ;;  %s5342_s10 = inlined_call_operand.vmem [shape: f32[3,1,32], index: 10, kind: input, shape index: {}]   ;;  %s5343_s11 = inlined_call_operand.hbm [shape: f32[2,2,128], index: 11, kind: output, shape index: {}]  }
   0x1   :  { %5410 = sst [smem:[#allocation65_spill]] %s5332_s0 }
   0x2   :  { %16 = vsyncpa [#allocation7], 0 }
   0x3   :  { %18 = vsyncpa [#allocation7 + $0x1], 0  ;;  %s4010_s17 = smov 0   ;;  %s4012_s18 = smov 0  }
   0x4   :  { %s4014_s19 = smov 0   ;;  %s4016_s20 = smov 0  }
   0x5   :  { %s4018_s21 = smov 0   ;;  %s4020_s22 = smov 0  }
   0x6 LB: > { %5411 = sst [smem:[#allocation9_spill]] %s3928_s21  ;;  %s3307_s23 = sadd.s32 4294967295, %s3932_s22   ;;  %s3932_s22 = sphi %s4020_s22, %s24_s22   ;;  %s3928_s21 = sphi %s4018_s21, %s5565_s21   ;;  %s3924_s20 = sphi %s4016_s20, %s5564_s20   ;;  %s3920_s19 = sphi %s4014_s19, %s5568_s19   ;;  %s3916_s18 = sphi %s4012_s18, %s5567_s18   ;;  %s3912_s17 = sphi %s4010_s17, %s5566_s17  }
   0x7   : > { %s3308_s24 = sadd.s32 4294967294, %s3932_s22   ;;  %s39_s25 = sadd.s32 1, %s3928_s21 }
   0x8   : > { %s304_s26 = sadd.s32 1, %s3920_s19  ;;  %p41_p0 = scmp.ge.s32.totalorder %s39_s25, 2 }
   0x9   : > { %p314_p1 = scmp.ne.s32.totalorder %s3920_s19, %s3916_s18  ;;  %p315_p2 = scmp.eq.s32.totalorder %s3307_s23, 1 }
   0xa   : > { %p320_p3 = scmp.ne.s32.totalorder %s3916_s18, %s3912_s17  ;;  %s5570_s25 = smov (%p41_p0, %s39_s25), 0 }
   0xb   : > { %5412 = sst [smem:[#allocation10_spill]] %s5570_s25  ;;  %p4050_p4 = por %p315_p2, %p314_p1 }
   0xc   : > { %p321_p5 = scmp.eq.s32.totalorder %s3308_s24, 1  ;;  %s297_s28 = ssub.s32 %s3928_s21, %s5570_s25 }
   0xd   : > { %p3313_p6 = scmp.ge.s32.totalorder %s3932_s22, 1  ;;  %p302_p7 = scmp.eq.s32.totalorder %s297_s28, 0 }
   0xe   : > { %p4057_p8 = por %p321_p5, %p320_p3  ;;  %p395_p9 = scmp.lt.s32.totalorder %s3932_s22, 3 }
   0xf   : > { %s4063_s30 = scalar_select %p302_p7, %s3920_s19, %s304_s26  }
  0x10   : > { %p396_p10 = pnand %p3313_p6, %p395_p9 }
  0x12   : > { %399 = sbr.rel (%p396_p10) target bundleno = 2487 (0x9b7), region = 64 }
  0x19   : > { %s5345_s12 = sand.u32 1, %s3916_s18   ;;  %s5415_s0 = sld [smem:[#allocation65_spill]]  ;;  %v506_v32 = vld [vmem:[%s5333_s1] sm:$0x3] }
  0x1a   : > { %p509_p11 = scmp.eq.s32.totalorder %s3924_s20, 0  ;;  %s4084_s26 = sshll.u32 %s5345_s12, 1  ;;  %v507_v33 = vsub.f32 1.0, %v506_v32 }
  0x1b   : > { %s4237_s25 = scalar_lea.vmem [#allocation6], %s4084_s26  ;;  %v516_v35 = vld [vmem:[%s5335_s3] sm:$0xff] (%p509_p11)  ;;  %v517_v36 = vld [vmem:[%s5335_s3 + $0x8] sm:$0xff] (%p509_p11)  ;;  %v518_v37 = vld [vmem:[%s5335_s3 + $0x10] sm:$0xff] (%p509_p11)  ;;  %v3934_v38 = vmov (%p509_p11), 0.0|0.0   ;;  %vm3935_vm0 = vmmov (%p509_p11), 0  }
  0x1c   : > { %v4234_v34 = vmul.f32 -10000.0, %v507_v33  ;;  %3597 = vmatprep.subr.bf16.mxu0 (%p509_p11), %v3934_v38  ;;  %v3598_v39 = vpack.c.bf16 (%p509_p11), %v517_v36, %v516_v35  ;;  %v519_v40 = vld [vmem:[%s5335_s3 + $0x18] sm:$0xff] (%p509_p11)  ;;  %v3936_v41 = vmov (%p509_p11), 0.0   ;;  %vm603_vm1 = vcmask (%p509_p11), 1024   ;;  %v515_v44 = vld [vmem:[%s5334_s2] sm:$0x3] (%p509_p11) }
  0x1d   : > { %3447 = vmatprep.mubr.msk.f32.mxu0 (%p509_p11), %vm3935_vm0, %v3936_v41  ;;  %v3937_v42 = vmov (%p509_p11), -inf   ;;  %605 = vst.msk [vmem:[#allocation4] sm:$0x3] (%p509_p11), %vm603_vm1, %v3936_v41  ;;  %v3601_v43 = vpack.c.bf16 (%p509_p11), %v519_v40, %v518_v37  ;;  %vm527_vm2 = vcmask (%p509_p11), 261120   ;;  %vm601_vm3 = vcmask (%p509_p11), 254976  }
  0x1e   : > { %5448 = vst [vmem:[#allocation43_spill] sm:$0xff] %v4234_v34  ;;  %604 = vst.msk [vmem:[#allocation3] sm:$0x3] (%p509_p11), %vm603_vm1, %v3937_v42  ;;  %3599 = vmatpush3.bf16.msra.mxu0 (%p509_p11), %v3598_v39  ;;  %v3316_v45 = vld [vmem:[%s5336_s4] ss:$0 sm:$0xff] (%p509_p11) }
  0x1f   : > { %v4069_v0 = vld [vmem:[%s5415_s0] sm:$0xff]  ;;  %v4074_v1 = vld [vmem:[%s5415_s0 + $0x8] sm:$0xff]  ;;  %v4079_v2 = vld [vmem:[%s5415_s0 + $0x10] sm:$0xff]  ;;  %3600 = vmatprep.subr.bf16.mxu0 (%p509_p11), %v3934_v38  ;;  %606 = vst.msk [vmem:[#allocation5] sm:$0x3] (%p509_p11), %vm601_vm3, %v3936_v41 }
  0x20   : > { %5416 = vst [vmem:[#allocation11_spill] sm:$0xff] %v4069_v0  ;;  %5417 = vst [vmem:[#allocation12_spill] sm:$0xff] %v4074_v1  ;;  %v4089_v3 = vld [vmem:[%s5415_s0 + $0x18] sm:$0xff]  ;;  %v4094_v4 = vld [vmem:[%s5415_s0 + $0x20] sm:$0xff] }
  0x21   : > { %5418 = vst [vmem:[#allocation13_spill] sm:$0xff] %v4079_v2  ;;  %5419 = vst [vmem:[#allocation14_spill] sm:$0xff] %v4089_v3  ;;  %v4099_v5 = vld [vmem:[%s5415_s0 + $0x28] sm:$0xff]  ;;  %v4104_v6 = vld [vmem:[%s5415_s0 + $0x30] sm:$0xff] }
  0x22   : > { %5420 = vst [vmem:[#allocation15_spill] sm:$0xff] %v4094_v4  ;;  %5421 = vst [vmem:[#allocation16_spill] sm:$0xff] %v4099_v5  ;;  %v4109_v7 = vld [vmem:[%s5415_s0 + $0x38] sm:$0xff]  ;;  %v4114_v8 = vld [vmem:[%s5415_s0 + $0x40] sm:$0xff]  ;;  %3602 = vmatpush3.bf16.msra.mxu0 (%p509_p11), %v3601_v43 }
  0x23   : > { %5422 = vst [vmem:[#allocation17_spill] sm:$0xff] %v4104_v6  ;;  %5423 = vst [vmem:[#allocation18_spill] sm:$0xff] %v4109_v7  ;;  %v4119_v9 = vld [vmem:[%s5415_s0 + $0x48] sm:$0xff]  ;;  %v4124_v10 = vld [vmem:[%s5415_s0 + $0x50] sm:$0xff] }
  0x24   : > { %5424 = vst [vmem:[#allocation19_spill] sm:$0xff] %v4114_v8  ;;  %5425 = vst [vmem:[#allocation20_spill] sm:$0xff] %v4119_v9  ;;  %v4129_v11 = vld [vmem:[%s5415_s0 + $0x58] sm:$0xff]  ;;  %v4134_v12 = vld [vmem:[%s5415_s0 + $0x60] sm:$0xff] }
  0x25   : > { %5426 = vst [vmem:[#allocation21_spill] sm:$0xff] %v4124_v10  ;;  %5427 = vst [vmem:[#allocation22_spill] sm:$0xff] %v4129_v11  ;;  %v4139_v13 = vld [vmem:[%s5415_s0 + $0x68] sm:$0xff]  ;;  %v4144_v14 = vld [vmem:[%s5415_s0 + $0x70] sm:$0xff]  ;;  %3448 = vmatmul.mubr.msk.f32.vlgmr.msra.gmra.mrb[0].mxu0 (%p509_p11), %vm527_vm2, %v515_v44 }
  0x26   : > { %5428 = vst [vmem:[#allocation23_spill] sm:$0xff] %v4134_v12  ;;  %5429 = vst [vmem:[#allocation24_spill] sm:$0xff] %v4139_v13  ;;  %v4149_v15 = vld [vmem:[%s5415_s0 + $0x78] sm:$0xff]  ;;  %v4154_v16 = vld [vmem:[%s5415_s0 + $0x80] sm:$0xff] }
  0x27   : > { %5430 = vst [vmem:[#allocation25_spill] sm:$0xff] %v4144_v14  ;;  %5431 = vst [vmem:[#allocation26_spill] sm:$0xff] %v4149_v15  ;;  %v4159_v17 = vld [vmem:[%s5415_s0 + $0x88] sm:$0xff]  ;;  %v4164_v18 = vld [vmem:[%s5415_s0 + $0x90] sm:$0xff] }
  0x28   : > { %5432 = vst [vmem:[#allocation27_spill] sm:$0xff] %v4154_v16  ;;  %5433 = vst [vmem:[#allocation28_spill] sm:$0xff] %v4159_v17  ;;  %v4169_v19 = vld [vmem:[%s5415_s0 + $0x98] sm:$0xff]  ;;  %v4174_v20 = vld [vmem:[%s5415_s0 + $0xa0] sm:$0xff] }
  0x29   : > { %5434 = vst [vmem:[#allocation29_spill] sm:$0xff] %v4164_v18  ;;  %5435 = vst [vmem:[#allocation30_spill] sm:$0xff] %v4169_v19  ;;  %v4179_v21 = vld [vmem:[%s5415_s0 + $0xa8] sm:$0xff]  ;;  %v4184_v22 = vld [vmem:[%s5415_s0 + $0xb0] sm:$0xff]  ;;  %514 = sbr.rel (!%p509_p11) target bundleno = 252 (0xfc), region = 68 }
  0x2a   : > { %5436 = vst [vmem:[#allocation31_spill] sm:$0xff] %v4174_v20  ;;  %5437 = vst [vmem:[#allocation32_spill] sm:$0xff] %v4179_v21  ;;  %v4189_v23 = vld [vmem:[%s5415_s0 + $0xb8] sm:$0xff]  ;;  %v4194_v24 = vld [vmem:[%s5415_s0 + $0xc0] sm:$0xff] }
  0x2b   : > { %5438 = vst [vmem:[#allocation33_spill] sm:$0xff] %v4184_v22  ;;  %5439 = vst [vmem:[#allocation34_spill] sm:$0xff] %v4189_v23  ;;  %v4199_v25 = vld [vmem:[%s5415_s0 + $0xc8] sm:$0xff]  ;;  %v4204_v26 = vld [vmem:[%s5415_s0 + $0xd0] sm:$0xff] }
  0x2c   : > { %5440 = vst [vmem:[#allocation35_spill] sm:$0xff] %v4194_v24  ;;  %5441 = vst [vmem:[#allocation36_spill] sm:$0xff] %v4199_v25  ;;  %v4209_v27 = vld [vmem:[%s5415_s0 + $0xd8] sm:$0xff]  ;;  %v4214_v28 = vld [vmem:[%s5415_s0 + $0xe0] sm:$0xff] }
  0x2d   : > { %5442 = vst [vmem:[#allocation37_spill] sm:$0xff] %v4204_v26  ;;  %5443 = vst [vmem:[#allocation38_spill] sm:$0xff] %v4209_v27  ;;  %v4219_v29 = vld [vmem:[%s5415_s0 + $0xe8] sm:$0xff]  ;;  %v4224_v30 = vld [vmem:[%s5415_s0 + $0xf0] sm:$0xff] }
  0x2e   : > { %5444 = vst [vmem:[#allocation39_spill] sm:$0xff] %v4214_v28  ;;  %5445 = vst [vmem:[#allocation40_spill] sm:$0xff] %v4219_v29  ;;  %v4229_v31 = vld [vmem:[%s5415_s0 + $0xf8] sm:$0xff] }
  0x2f   : > { %5446 = vst [vmem:[#allocation41_spill] sm:$0xff] %v4224_v30  ;;  %5447 = vst [vmem:[#allocation42_spill] sm:$0xff] %v4229_v31 }
  0xf8   : > { %v597_v46 = vpop.f32.mrb[0].mxu0 }
  0xf9   : > { %v598_v47 = vadd.f32 %v3316_v45, %v597_v46  ;;  %v3449_v48 = vpop.f32.mrb[1].mxu0 }
  0xfb   : > { %602 = vst.msk [vmem:[#allocation2] sm:$0x3] %vm601_vm3, %v598_v47 }
  0xfc PF: > { %p3318_p12 = scmp.ne.s32.totalorder %s3924_s20, 0 }
  0xfe   : > { %609 = sbr.rel (%p3318_p12) target bundleno = 1400 (0x578), region = 72 }
 0x105   : > { %v3319_v49 = vld.sshfl [vmem:[#allocation2] sm:$0x11 pattern:$0x75316420]  ;;  %v5348_v50 = vlaneseq  ;;  %v3938_v51 = vmov 1966171168  }
 0x106   : > { %v621_v52 = vunpack.c.l.s4 %v3938_v51  ;;  %v619_v55 = vcombine.high %v3319_v49, %v3319_v49  ;;  %vm676_vm4 = vcmask 261120   ;;  %vm1111_vm5 = vcmask 130112  }
 0x107   : > { %v4261_v53 = vshrl.u32 %v5348_v50, 7  ;;  %vm1118_vm6 = vcmask 195712   ;;  %vm1125_vm7 = vcmask 261312   ;;  %vm1132_vm8 = vcmask 326912  }
 0x108   : > { %v622_v54 = vunpack.c.0.s8 %v621_v52  ;;  %vm1139_vm9 = vcmask 392512   ;;  %vm1146_vm10 = vcmask 458112   ;;  %vm1153_vm11 = vcmask 523712  }
 0x109   : > { %v4265_v57 = vsub.s32 0, %v4261_v53  ;;  %vm1160_vm12 = vcmask 589312   ;;  %vm1167_vm13 = vcmask 654912   ;;  %vm1174_vm14 = vcmask 720512  }
 0x10a   : > { %v625_v56 = vsub.s32 %v622_v54, %v4261_v53  ;;  %vm5407_vm15 = vcmask 786112   ;;  %vm1188_vm0 = vcmask 851712   ;;  %vm5408_vm1 = vcmask 917312  }
 0x10b   : > { %vm1202_vm2 = vcmask 982912   ;;  %vm1209_vm3 = vcmask 1048512  }
 0x10c   : > { %v626_v58 = vrot.slane %v3319_v49, %v625_v56  ;;  %v633_v59 = vrot.slane %v619_v55, %v625_v56 }
 0x10e   : > { %v4268_v60 = vrot.slane %v626_v58, %v4265_v57  ;;  %v4271_v61 = vrot.slane %v633_v59, %v4265_v57 }
 0x110   : > { %v644_v62 = vmul.f32 %v4268_v60, %v4069_v0  ;;  %v660_v63 = vmul.f32 %v4271_v61, %v4154_v16  ;;  %v645_v32 = vmul.f32 %v4268_v60, %v4074_v1  ;;  %v661_v33 = vmul.f32 %v4271_v61, %v4159_v17 }
 0x111   : > { %v646_v39 = vmul.f32 %v4268_v60, %v4079_v2  ;;  %v662_v40 = vmul.f32 %v4271_v61, %v4164_v18  ;;  %v647_v43 = vmul.f32 %v4268_v60, %v4089_v3  ;;  %v663_v44 = vmul.f32 %v4271_v61, %v4169_v19 }
 0x112   : > { %v677_v35 = vsel %vm676_vm4, %v644_v62, 0.0  ;;  %v725_v36 = vsel %vm676_vm4, %v660_v63, 0.0  ;;  %v680_v37 = vsel %vm676_vm4, %v645_v32, 0.0  ;;  %v728_v38 = vsel %vm676_vm4, %v661_v33, 0.0 }
 0x113   : > { %678 = vadd.xlane.f32.xlu0 %v677_v35  ;;  %726 = vadd.xlane.f32.xlu1 %v725_v36  ;;  %v683_v41 = vsel %vm676_vm4, %v646_v39, 0.0  ;;  %v731_v42 = vsel %vm676_vm4, %v662_v40, 0.0  ;;  %v686_v45 = vsel %vm676_vm4, %v647_v43, 0.0  ;;  %v734_v46 = vsel %vm676_vm4, %v663_v44, 0.0 }
 0x114   : > { %v648_v47 = vmul.f32 %v4268_v60, %v4094_v4  ;;  %v664_v48 = vmul.f32 %v4271_v61, %v4174_v20  ;;  %v649_v52 = vmul.f32 %v4268_v60, %v4099_v5  ;;  %v665_v54 = vmul.f32 %v4271_v61, %v4179_v21 }
 0x115   : > { %v650_v58 = vmul.f32 %v4268_v60, %v4104_v6  ;;  %v666_v59 = vmul.f32 %v4271_v61, %v4184_v22  ;;  %v651_v32 = vmul.f32 %v4268_v60, %v4109_v7  ;;  %v667_v33 = vmul.f32 %v4271_v61, %v4189_v23 }
 0x116   : > { %v689_v49 = vsel %vm676_vm4, %v648_v47, 0.0  ;;  %v737_v51 = vsel %vm676_vm4, %v664_v48, 0.0  ;;  %v692_v55 = vsel %vm676_vm4, %v649_v52, 0.0  ;;  %v740_v56 = vsel %vm676_vm4, %v665_v54, 0.0 }
 0x117   : > { %681 = vadd.xlane.f32.xlu0 %v680_v37  ;;  %729 = vadd.xlane.f32.xlu1 %v728_v38  ;;  %v695_v62 = vsel %vm676_vm4, %v650_v58, 0.0  ;;  %v743_v63 = vsel %vm676_vm4, %v666_v59, 0.0  ;;  %v698_v35 = vsel %vm676_vm4, %v651_v32, 0.0  ;;  %v746_v36 = vsel %vm676_vm4, %v667_v33, 0.0 }
 0x118   : > { %v652_v37 = vmul.f32 %v4268_v60, %v4114_v8  ;;  %v668_v38 = vmul.f32 %v4271_v61, %v4194_v24  ;;  %v5467_v22 = vlaneseq }
 0x11a   : > { %v701_v39 = vsel %vm676_vm4, %v652_v37, 0.0  ;;  %v749_v40 = vsel %vm676_vm4, %v668_v38, 0.0  ;;  %v1101_v5 = vand.u32 127, %v5467_v22 }
 0x11b   : > { %684 = vadd.xlane.f32.xlu0 %v683_v41  ;;  %732 = vadd.xlane.f32.xlu1 %v731_v42  ;;  %v653_v41 = vmul.f32 %v4268_v60, %v4119_v9  ;;  %v669_v42 = vmul.f32 %v4271_v61, %v4199_v25 }
 0x11c   : > { %v1106_v21 = vadd.s32 4294967288, %v1101_v5  ;;  %v1113_v20 = vadd.s32 4294967280, %v1101_v5  ;;  %v1120_v3 = vadd.s32 4294967272, %v1101_v5  ;;  %v1127_v19 = vadd.s32 4294967264, %v1101_v5 }
 0x11d   : > { %v704_v43 = vsel %vm676_vm4, %v653_v41, 0.0  ;;  %v752_v44 = vsel %vm676_vm4, %v669_v42, 0.0  ;;  %v4566_v18 = vsub.s32 %v1101_v5, %v4261_v53  ;;  %v1134_v0 = vadd.s32 4294967256, %v1101_v5 }
 0x11e   : > { %v4569_v1 = vsub.s32 %v1106_v21, %v4261_v53  ;;  %v4572_v22 = vsub.s32 %v1113_v20, %v4261_v53  ;;  %v1148_v17 = vadd.s32 4294967240, %v1101_v5  ;;  %v4575_v16 = vsub.s32 %v1120_v3, %v4261_v53 }
 0x11f   : > { %687 = vadd.xlane.f32.xlu0 %v686_v45  ;;  %735 = vadd.xlane.f32.xlu1 %v734_v46  ;;  %v654_v45 = vmul.f32 %v4268_v60, %v4124_v10  ;;  %v670_v46 = vmul.f32 %v4271_v61, %v4204_v26  ;;  %v4582_v21 = vsub.s32 %v1127_v19, %v4261_v53 }
 0x120   : > { %5468 = vst [vmem:[#allocation62_spill] sm:$0xff] %v4572_v22  ;;  %5469 = vst [vmem:[#allocation63_spill] sm:$0xff] %v4575_v16  ;;  %v4585_v20 = vsub.s32 %v1134_v0, %v4261_v53 }
 0x121   : > { %v707_v47 = vsel %vm676_vm4, %v654_v45, 0.0  ;;  %v755_v48 = vsel %vm676_vm4, %v670_v46, 0.0  ;;  %v3939_v45 = vmov 0   ;;  %5470 = vst [vmem:[#allocation64_spill] sm:$0xff] %v4582_v21 }
 0x122   : > { %3772 = vset.pattern.permute.xlu1 %v3939_v45  ;;  %3771 = vset.pattern.permute.xlu0 %v3939_v45 }
 0x123   : > { %690 = vadd.xlane.f32.xlu0 %v689_v49  ;;  %738 = vadd.xlane.f32.xlu1 %v737_v51  ;;  %v655_v49 = vmul.f32 %v4268_v60, %v4129_v11  ;;  %v671_v51 = vmul.f32 %v4271_v61, %v4209_v27 }
 0x125   : > { %v710_v52 = vsel %vm676_vm4, %v655_v49, 0.0  ;;  %v758_v54 = vsel %vm676_vm4, %v671_v51, 0.0 }
 0x127   : > { %693 = vadd.xlane.f32.xlu0 %v692_v55  ;;  %741 = vadd.xlane.f32.xlu1 %v740_v56  ;;  %v656_v55 = vmul.f32 %v4268_v60, %v4134_v12  ;;  %v672_v56 = vmul.f32 %v4271_v61, %v4214_v28 }
 0x129   : > { %v713_v58 = vsel %vm676_vm4, %v656_v55, 0.0  ;;  %v761_v59 = vsel %vm676_vm4, %v672_v56, 0.0 }
 0x12b   : > { %696 = vadd.xlane.f32.xlu0 %v695_v62  ;;  %744 = vadd.xlane.f32.xlu1 %v743_v63  ;;  %v657_v62 = vmul.f32 %v4268_v60, %v4139_v13  ;;  %v673_v63 = vmul.f32 %v4271_v61, %v4219_v29 }
 0x12d   : > { %v716_v32 = vsel %vm676_vm4, %v657_v62, 0.0  ;;  %v764_v33 = vsel %vm676_vm4, %v673_v63, 0.0 }
 0x12f   : > { %699 = vadd.xlane.f32.xlu0 %v698_v35  ;;  %747 = vadd.xlane.f32.xlu1 %v746_v36  ;;  %v658_v35 = vmul.f32 %v4268_v60, %v4144_v14  ;;  %v674_v36 = vmul.f32 %v4271_v61, %v4224_v30 }
 0x131   : > { %v719_v37 = vsel %vm676_vm4, %v658_v35, 0.0  ;;  %v767_v38 = vsel %vm676_vm4, %v674_v36, 0.0 }
 0x133   : > { %702 = vadd.xlane.f32.xlu0 %v701_v39  ;;  %750 = vadd.xlane.f32.xlu1 %v749_v40  ;;  %v659_v39 = vmul.f32 %v4268_v60, %v4149_v15  ;;  %v675_v40 = vmul.f32 %v4271_v61, %v4229_v31 }
 0x135   : > { %v722_v41 = vsel %vm676_vm4, %v659_v39, 0.0  ;;  %v770_v42 = vsel %vm676_vm4, %v675_v40, 0.0  ;;  %vm1290_vm4 = vcmask 1041409  }
 0x137   : > { %705 = vadd.xlane.f32.xlu0 %v704_v43  ;;  %753 = vadd.xlane.f32.xlu1 %v752_v44  ;;  %v777_v43 = vrot.slane %v4234_v34, %v4265_v57  ;;  %v5347_v44 = vsub.s32 1, %v4261_v53 }
 0x139   : > { %v844_v60 = vrot.slane %v4234_v34, %v5347_v44 }
 0x13b   : > { %708 = vadd.xlane.f32.xlu0 %v707_v47  ;;  %756 = vadd.xlane.f32.xlu1 %v755_v48 }
 0x13f   : > { %711 = vadd.xlane.f32.xlu0 %v710_v52  ;;  %759 = vadd.xlane.f32.xlu1 %v758_v54 }
 0x143   : > { %714 = vadd.xlane.f32.xlu0 %v713_v58  ;;  %762 = vadd.xlane.f32.xlu1 %v761_v59 }
 0x147   : > { %717 = vadd.xlane.f32.xlu0 %v716_v32  ;;  %765 = vadd.xlane.f32.xlu1 %v764_v33 }
 0x14b   : > { %720 = vadd.xlane.f32.xlu0 %v719_v37  ;;  %768 = vadd.xlane.f32.xlu1 %v767_v38 }
 0x14f   : > { %723 = vadd.xlane.f32.xlu0 %v722_v41  ;;  %771 = vadd.xlane.f32.xlu1 %v770_v42 }
 0x160   : > { %783 = vbcast.lane.b32.xlu1 %v777_v43, 264 }
 0x164   : > { %846 = vbcast.lane.b32.xlu1 %v844_v60, 256 }
 0x165   : > { %779 = vbcast.lane.b32.xlu0 %v777_v43, 256 }
 0x168   : > { %850 = vbcast.lane.b32.xlu1 %v844_v60, 264 }
 0x169   : > { %787 = vbcast.lane.b32.xlu0 %v777_v43, 272 }
 0x16c   : > { %854 = vbcast.lane.b32.xlu1 %v844_v60, 272 }
 0x16d   : > { %791 = vbcast.lane.b32.xlu0 %v777_v43, 280 }
 0x170   : > { %858 = vbcast.lane.b32.xlu1 %v844_v60, 280 }
 0x171   : > { %795 = vbcast.lane.b32.xlu0 %v777_v43, 288 }
 0x174   : > { %862 = vbcast.lane.b32.xlu1 %v844_v60, 288 }
 0x175   : > { %799 = vbcast.lane.b32.xlu0 %v777_v43, 296 }
 0x178   : > { %866 = vbcast.lane.b32.xlu1 %v844_v60, 296 }
 0x179   : > { %803 = vbcast.lane.b32.xlu0 %v777_v43, 304 }
 0x17c   : > { %870 = vbcast.lane.b32.xlu1 %v844_v60, 304 }
 0x17d   : > { %807 = vbcast.lane.b32.xlu0 %v777_v43, 312 }
 0x180   : > { %874 = vbcast.lane.b32.xlu1 %v844_v60, 312 }
 0x181   : > { %811 = vbcast.lane.b32.xlu0 %v777_v43, 320 }
 0x184   : > { %878 = vbcast.lane.b32.xlu1 %v844_v60, 320 }
 0x185   : > { %815 = vbcast.lane.b32.xlu0 %v777_v43, 328 }
 0x188   : > { %882 = vbcast.lane.b32.xlu1 %v844_v60, 328 }
 0x189   : > { %819 = vbcast.lane.b32.xlu0 %v777_v43, 336 }
 0x18c   : > { %886 = vbcast.lane.b32.xlu1 %v844_v60, 336 }
 0x18d   : > { %823 = vbcast.lane.b32.xlu0 %v777_v43, 344 }
 0x190   : > { %890 = vbcast.lane.b32.xlu1 %v844_v60, 344 }
 0x191   : > { %827 = vbcast.lane.b32.xlu0 %v777_v43, 352 }
 0x194   : > { %894 = vbcast.lane.b32.xlu1 %v844_v60, 352 }
 0x195   : > { %831 = vbcast.lane.b32.xlu0 %v777_v43, 360 }
 0x198   : > { %898 = vbcast.lane.b32.xlu1 %v844_v60, 360 }
 0x199   : > { %835 = vbcast.lane.b32.xlu0 %v777_v43, 368 }
 0x19c   : > { %902 = vbcast.lane.b32.xlu1 %v844_v60, 368 }
 0x19d   : > { %839 = vbcast.lane.b32.xlu0 %v777_v43, 376 }
 0x1a0   : > { %v679_v61 = vpop.xlane.xlu0 %678  ;;  %v727_v46 = vpop.xlane.xlu1 %726  ;;  %906 = vbcast.lane.b32.xlu1 %v844_v60, 376 }
 0x1a4   : > { %v682_v47 = vpop.xlane.xlu0 %681  ;;  %v730_v48 = vpop.xlane.xlu1 %729 }
 0x1a8   : > { %v685_v49 = vpop.xlane.xlu0 %684  ;;  %v733_v51 = vpop.xlane.xlu1 %732 }
 0x1ac   : > { %v688_v52 = vpop.xlane.xlu0 %687  ;;  %v736_v54 = vpop.xlane.xlu1 %735 }
 0x1b0   : > { %v691_v55 = vpop.xlane.xlu0 %690  ;;  %v739_v56 = vpop.xlane.xlu1 %738 }
 0x1b4   : > { %v694_v58 = vpop.xlane.xlu0 %693  ;;  %v742_v59 = vpop.xlane.xlu1 %741 }
 0x1b8   : > { %v697_v62 = vpop.xlane.xlu0 %696  ;;  %v745_v63 = vpop.xlane.xlu1 %744 }
 0x1bc   : > { %v700_v32 = vpop.xlane.xlu0 %699  ;;  %v4375_v33 = vpop.xlane.xlu1 %747 }
 0x1c0   : > { %v4377_v35 = vpop.xlane.xlu0 %702  ;;  %v4379_v36 = vpop.xlane.xlu1 %750 }
 0x1c4   : > { %v4381_v37 = vpop.xlane.xlu0 %705  ;;  %v4383_v38 = vpop.xlane.xlu1 %753 }
 0x1c8   : > { %v4385_v39 = vpop.xlane.xlu0 %708  ;;  %v4387_v40 = vpop.xlane.xlu1 %756 }
 0x1cc   : > { %v4389_v41 = vpop.xlane.xlu0 %711  ;;  %v4391_v42 = vpop.xlane.xlu1 %759 }
 0x1d0   : > { %v4393_v43 = vpop.xlane.xlu0 %714  ;;  %v4395_v60 = vpop.xlane.xlu1 %762 }
 0x1d4   : > { %v4397_v45 = vpop.xlane.xlu0 %717  ;;  %v4399_v44 = vpop.xlane.xlu1 %765 }
 0x1d8   : > { %v4401_v50 = vpop.xlane.xlu0 %720  ;;  %v4403_v34 = vpop.xlane.xlu1 %768 }
 0x1dc   : > { %v4405_v15 = vpop.xlane.xlu0 %723  ;;  %v4407_v14 = vpop.xlane.xlu1 %771 }
 0x1e0   : > { %v780_v31 = vpop.permute.xlu0 %779  ;;  %v784_v30 = vpop.permute.xlu1 %783 }
 0x1e1   : > { %v4409_v13 = vadd.f32 %v780_v31, %v679_v61  ;;  %v4411_v12 = vadd.f32 %v784_v30, %v682_v47 }
 0x1e3   : > { %1005 = vperm.xlu0 %3771, %v4409_v13   ;;  %1008 = vperm.xlu1 %3772, %v4411_v12  }
 0x1e4   : > { %v788_v29 = vpop.permute.xlu0 %787  ;;  %v847_v28 = vpop.permute.xlu1 %846 }
 0x1e5   : > { %v4415_v11 = vadd.f32 %v847_v28, %v727_v46  ;;  %v4418_v26 = vadd.f32 %v788_v29, %v685_v49 }
 0x1e7   : > { %1053 = vperm.xlu1 %3772, %v4415_v11  }
 0x1e8   : > { %v792_v10 = vpop.permute.xlu0 %791  ;;  %v851_v27 = vpop.permute.xlu1 %850 }
 0x1e9   : > { %v4420_v9 = vadd.f32 %v851_v27, %v730_v48  ;;  %v4424_v61 = vadd.f32 %v792_v10, %v688_v52 }
 0x1eb   : > { %1011 = vperm.xlu1 %3772, %v4418_v26   ;;  %1056 = vperm.xlu0 %3771, %v4420_v9  }
 0x1ec   : > { %v796_v30 = vpop.permute.xlu0 %795  ;;  %v855_v31 = vpop.permute.xlu1 %854 }
 0x1ed   : > { %v4426_v47 = vadd.f32 %v855_v31, %v733_v51  ;;  %v4430_v29 = vadd.f32 %v796_v30, %v691_v55 }
 0x1ef   : > { %1014 = vperm.xlu1 %3772, %v4424_v61   ;;  %1059 = vperm.xlu0 %3771, %v4426_v47   ;;  %5449 = vst [vmem:[#allocation44_spill] sm:$0xff] %v4430_v29 }
 0x1f0   : > { %v800_v28 = vpop.permute.xlu0 %799  ;;  %v859_v46 = vpop.permute.xlu1 %858 }
 0x1f1   : > { %v4432_v27 = vadd.f32 %v859_v46, %v736_v54  ;;  %v4436_v10 = vadd.f32 %v800_v28, %v694_v58 }
 0x1f3   : > { %1017 = vperm.xlu1 %3772, %v4430_v29   ;;  %1062 = vperm.xlu0 %3771, %v4432_v27   ;;  %5450 = vst [vmem:[#allocation45_spill] sm:$0xff] %v4436_v10 }
 0x1f4   : > { %v804_v48 = vpop.permute.xlu0 %803  ;;  %v863_v49 = vpop.permute.xlu1 %862 }
 0x1f5   : > { %v4438_v51 = vadd.f32 %v863_v49, %v739_v56  ;;  %v4442_v55 = vadd.f32 %v804_v48, %v697_v62 }
 0x1f7   : > { %5451 = vst [vmem:[#allocation46_spill] sm:$0xff] %v4438_v51  ;;  %1020 = vperm.xlu1 %3772, %v4436_v10   ;;  %1065 = vperm.xlu0 %3771, %v4438_v51   ;;  %v4591_v10 = vsub.s32 %v1148_v17, %v4261_v53 }
 0x1f8   : > { %v808_v52 = vpop.permute.xlu0 %807  ;;  %v867_v31 = vpop.permute.xlu1 %866 }
 0x1f9   : > { %v4444_v54 = vadd.f32 %v867_v31, %v742_v59  ;;  %v4448_v58 = vadd.f32 %v808_v52, %v700_v32 }
 0x1fb   : > { %5452 = vst [vmem:[#allocation47_spill] sm:$0xff] %v4444_v54  ;;  %1023 = vperm.xlu1 %3772, %v4442_v55   ;;  %1068 = vperm.xlu0 %3771, %v4444_v54   ;;  %v1204_v54 = vadd.s32 4294967176, %v1101_v5 }
 0x1fc   : > { %v812_v30 = vpop.permute.xlu0 %811  ;;  %v871_v46 = vpop.permute.xlu1 %870 }
 0x1fd   : > { %v4450_v56 = vadd.f32 %v871_v46, %v745_v63  ;;  %v4455_v62 = vadd.f32 %v812_v30, %v4377_v35 }
 0x1ff   : > { %5453 = vst [vmem:[#allocation48_spill] sm:$0xff] %v4450_v56  ;;  %1026 = vperm.xlu1 %3772, %v4448_v58   ;;  %1071 = vperm.xlu0 %3771, %v4450_v56   ;;  %v1190_v56 = vadd.s32 4294967192, %v1101_v5 }
 0x200   : > { %v816_v28 = vpop.permute.xlu0 %815  ;;  %v875_v49 = vpop.permute.xlu1 %874 }
 0x201   : > { %v4458_v59 = vadd.f32 %v875_v49, %v4375_v33  ;;  %v4463_v63 = vadd.f32 %v816_v28, %v4381_v37 }
 0x203   : > { %5454 = vst [vmem:[#allocation49_spill] sm:$0xff] %v4458_v59  ;;  %1029 = vperm.xlu1 %3772, %v4455_v62   ;;  %1074 = vperm.xlu0 %3771, %v4458_v59   ;;  %v1183_v59 = vadd.s32 4294967200, %v1101_v5 }
 0x204   : > { %v820_v32 = vpop.permute.xlu0 %819  ;;  %v879_v48 = vpop.permute.xlu1 %878 }
 0x205   : > { %v4466_v52 = vadd.f32 %v879_v48, %v4379_v36  ;;  %v4471_v33 = vadd.f32 %v820_v32, %v4385_v39 }
 0x207   : > { %5455 = vst [vmem:[#allocation50_spill] sm:$0xff] %v4466_v52  ;;  %1032 = vperm.xlu1 %3772, %v4463_v63   ;;  %1077 = vperm.xlu0 %3771, %v4466_v52   ;;  %v1176_v52 = vadd.s32 4294967208, %v1101_v5 }
 0x208   : > { %v824_v35 = vpop.permute.xlu0 %823  ;;  %v883_v31 = vpop.permute.xlu1 %882 }
 0x209   : > { %v4474_v30 = vadd.f32 %v883_v31, %v4383_v38  ;;  %v4479_v36 = vadd.f32 %v824_v35, %v4389_v41 }
 0x20b   : > { %5456 = vst [vmem:[#allocation51_spill] sm:$0xff] %v4474_v30  ;;  %1035 = vperm.xlu1 %3772, %v4471_v33   ;;  %1080 = vperm.xlu0 %3771, %v4474_v30   ;;  %v1169_v30 = vadd.s32 4294967216, %v1101_v5 }
 0x20c   : > { %v828_v37 = vpop.permute.xlu0 %827  ;;  %v887_v46 = vpop.permute.xlu1 %886 }
 0x20d   : > { %v4482_v28 = vadd.f32 %v887_v46, %v4387_v40  ;;  %v4487_v38 = vadd.f32 %v828_v37, %v4393_v43 }
 0x20f   : > { %5457 = vst [vmem:[#allocation52_spill] sm:$0xff] %v4482_v28  ;;  %1038 = vperm.xlu1 %3772, %v4479_v36   ;;  %1083 = vperm.xlu0 %3771, %v4482_v28   ;;  %5458 = vst [vmem:[#allocation53_spill] sm:$0xff] %v4487_v38 }
 0x210   : > { %v832_v39 = vpop.permute.xlu0 %831  ;;  %v891_v49 = vpop.permute.xlu1 %890 }
 0x211   : > { %v4490_v32 = vadd.f32 %v891_v49, %v4391_v42  ;;  %v4495_v40 = vadd.f32 %v832_v39, %v4397_v45 }
 0x213   : > { %5459 = vst [vmem:[#allocation54_spill] sm:$0xff] %v4490_v32  ;;  %1041 = vperm.xlu1 %3772, %v4487_v38   ;;  %1086 = vperm.xlu0 %3771, %v4490_v32   ;;  %5460 = vst [vmem:[#allocation55_spill] sm:$0xff] %v4495_v40 }
 0x214   : > { %v836_v41 = vpop.permute.xlu0 %835  ;;  %v895_v48 = vpop.permute.xlu1 %894 }
 0x215   : > { %v4498_v35 = vadd.f32 %v895_v48, %v4395_v60  ;;  %v4503_v42 = vadd.f32 %v836_v41, %v4401_v50 }
 0x217   : > { %5461 = vst [vmem:[#allocation56_spill] sm:$0xff] %v4498_v35  ;;  %1044 = vperm.xlu1 %3772, %v4495_v40   ;;  %1089 = vperm.xlu0 %3771, %v4498_v35   ;;  %5462 = vst [vmem:[#allocation57_spill] sm:$0xff] %v4503_v42  ;;  %v1162_v35 = vadd.s32 4294967224, %v1101_v5  ;;  %v1197_v40 = vadd.s32 4294967184, %v1101_v5 }
 0x218   : > { %v899_v43 = vpop.permute.xlu1 %898  ;;  %v840_v37 = vpop.permute.xlu0 %839 }
 0x219   : > { %v4506_v31 = vadd.f32 %v899_v43, %v4399_v44  ;;  %v4511_v60 = vadd.f32 %v840_v37, %v4405_v15 }
 0x21b   : > { %5463 = vst [vmem:[#allocation58_spill] sm:$0xff] %v4506_v31  ;;  %1047 = vperm.xlu1 %3772, %v4503_v42   ;;  %1092 = vperm.xlu0 %3771, %v4506_v31   ;;  %5464 = vst [vmem:[#allocation59_spill] sm:$0xff] %v4511_v60  ;;  %v1155_v31 = vadd.s32 4294967232, %v1101_v5  ;;  %v4597_v42 = vsub.s32 %v1162_v35, %v4261_v53 }
 0x21c   : > { %v903_v45 = vpop.permute.xlu1 %902 }
 0x21d   : > { %v4514_v46 = vadd.f32 %v903_v45, %v4403_v34  ;;  %v4594_v19 = vsub.s32 %v1155_v31, %v4261_v53  ;;  %v4610_v31 = vsub.s32 %v1169_v30, %v4261_v53 }
 0x21f   : > { %5465 = vst [vmem:[#allocation60_spill] sm:$0xff] %v4514_v46  ;;  %1050 = vperm.xlu1 %3772, %v4511_v60   ;;  %1095 = vperm.xlu0 %3771, %v4514_v46   ;;  %v1141_v46 = vadd.s32 4294967248, %v1101_v5  ;;  %v4617_v5 = vsub.s32 %v1176_v52, %v4261_v53 }
 0x220   : > { %v907_v50 = vpop.permute.xlu1 %906 }
 0x221   : > { %v4519_v44 = vadd.f32 %v907_v50, %v4407_v14  ;;  %v4588_v3 = vsub.s32 %v1141_v46, %v4261_v53 }
 0x223   : > { %5466 = vst [vmem:[#allocation61_spill] sm:$0xff] %v4519_v44  ;;  %1098 = vperm.xlu0 %3771, %v4519_v44  }
 0x262   : > { %v4522_v39 = vpop.permute.xlu1 %1008  ;;  %v4524_v49 = vpop.permute.xlu0 %1005 }
 0x263   : > { %v1105_v46 = vrot.slane %v4524_v49, %v4566_v18  ;;  %v1110_v17 = vrot.slane %v4522_v39, %v4569_v1  ;;  %v4620_v49 = vsub.s32 %v1183_v59, %v4261_v53 }
 0x266   : > { %v4526_v41 = vpop.permute.xlu1 %1053 }
 0x267   : > { %v1214_v39 = vrot.slane %v4526_v41, %v4566_v18  ;;  %v4636_v41 = vsub.s32 %v1197_v40, %v4261_v53 }
 0x26a   : > { %v4528_v15 = vpop.permute.xlu0 %1056  ;;  %v4530_v34 = vpop.permute.xlu1 %1011 }
 0x26b   : > { %v1218_v38 = vrot.slane %v4528_v15, %v4569_v1  ;;  %v1117_v35 = vrot.slane %v4530_v34, %v4572_v22  ;;  %v4629_v34 = vsub.s32 %v1190_v56, %v4261_v53 }
 0x26d   : > { %v1219_v56 = vsel %vm1111_vm5, %v1218_v38, %v1214_v39 }
 0x26e   : > { %v4532_v48 = vpop.permute.xlu0 %1059  ;;  %v4534_v43 = vpop.permute.xlu1 %1014 }
 0x26f   : > { %v1223_v51 = vrot.slane %v4532_v48, %v4572_v22  ;;  %v1124_v30 = vrot.slane %v4534_v43, %v4575_v16  ;;  %v4639_v43 = vsub.s32 %v1204_v54, %v4261_v53 }
 0x272   : > { %v4536_v37 = vpop.permute.xlu0 %1062  ;;  %v4538_v14 = vpop.permute.xlu1 %1017 }
 0x273   : > { %v1228_v15 = vrot.slane %v4536_v37, %v4575_v16  ;;  %v1131_v52 = vrot.slane %v4538_v14, %v4582_v21  ;;  %v1112_v37 = vsel %vm1111_vm5, %v1110_v17, %v1105_v46 }
 0x276   : > { %v4540_v45 = vpop.permute.xlu0 %1065  ;;  %v4542_v50 = vpop.permute.xlu1 %1020 }
 0x277   : > { %v1233_v59 = vrot.slane %v4540_v45, %v4582_v21  ;;  %v1138_v16 = vrot.slane %v4542_v50, %v4585_v20  ;;  %v1119_v45 = vsel %vm1118_vm6, %v1117_v35, %v1112_v37  ;;  %v1224_v21 = vsel %vm1118_vm6, %v1223_v51, %v1219_v56 }
 0x278   : > { %v1126_v38 = vsel %vm1125_vm7, %v1124_v30, %v1119_v45  ;;  %v1229_v46 = vsel %vm1125_vm7, %v1228_v15, %v1224_v21 }
 0x279   : > { %v1133_v17 = vsel %vm1132_vm8, %v1131_v52, %v1126_v38  ;;  %v1234_v51 = vsel %vm1132_vm8, %v1233_v59, %v1229_v46 }
 0x27a   : > { %v4544_v8 = vpop.permute.xlu0 %1068  ;;  %v4546_v25 = vpop.permute.xlu1 %1023  ;;  %v1140_v21 = vsel %vm1139_vm9, %v1138_v16, %v1133_v17 }
 0x27b   : > { %v1238_v14 = vrot.slane %v4544_v8, %v4585_v20  ;;  %v1145_v40 = vrot.slane %v4546_v25, %v4588_v3 }
 0x27d   : > { %v1239_v30 = vsel %vm1139_vm9, %v1238_v14, %v1234_v51  ;;  %v1147_v15 = vsel %vm1146_vm10, %v1145_v40, %v1140_v21 }
 0x27e   : > { %v4548_v24 = vpop.permute.xlu0 %1071  ;;  %v4550_v7 = vpop.permute.xlu1 %1026 }
 0x27f   : > { %v1243_v54 = vrot.slane %v4548_v24, %v4588_v3  ;;  %v1152_v50 = vrot.slane %v4550_v7, %v4591_v10 }
 0x281   : > { %v1244_v52 = vsel %vm1146_vm10, %v1243_v54, %v1239_v30  ;;  %v1154_v16 = vsel %vm1153_vm11, %v1152_v50, %v1147_v15 }
 0x282   : > { %v4552_v6 = vpop.permute.xlu0 %1074  ;;  %v4554_v23 = vpop.permute.xlu1 %1029 }
 0x283   : > { %v1248_v8 = vrot.slane %v4552_v6, %v4591_v10  ;;  %v1159_v25 = vrot.slane %v4554_v23, %v4594_v19 }
 0x285   : > { %v1249_v59 = vsel %vm1153_vm11, %v1248_v8, %v1244_v52  ;;  %v1161_v37 = vsel %vm1160_vm12, %v1159_v25, %v1154_v16 }
 0x286   : > { %v4557_v4 = vpop.permute.xlu0 %1077  ;;  %v4559_v60 = vpop.permute.xlu1 %1032 }
 0x287   : > { %v1253_v24 = vrot.slane %v4557_v4, %v4594_v19  ;;  %v1166_v7 = vrot.slane %v4559_v60, %v4597_v42 }
 0x289   : > { %v1254_v56 = vsel %vm1160_vm12, %v1253_v24, %v1249_v59  ;;  %v1168_v40 = vsel %vm1167_vm13, %v1166_v7, %v1161_v37  ;;  %v5471_v37 = vsub.s32 1, %v4261_v53 }
 0x28a   : > { %v4561_v2 = vpop.permute.xlu0 %1080  ;;  %v4563_v44 = vpop.permute.xlu1 %1035 }
 0x28b   : > { %v1258_v6 = vrot.slane %v4561_v2, %v4597_v42  ;;  %v1173_v23 = vrot.slane %v4563_v44, %v4610_v31 }
 0x28d   : > { %v1259_v54 = vsel %vm1167_vm13, %v1258_v6, %v1254_v56 }
 0x28e   : > { %v4577_v32 = vpop.permute.xlu0 %1083  ;;  %v4579_v28 = vpop.permute.xlu1 %1038 }
 0x28f   : > { %v1263_v4 = vrot.slane %v4577_v32, %v4610_v31  ;;  %v1180_v60 = vrot.slane %v4579_v28, %v4617_v5 }
 0x291   : > { %v1264_v46 = vsel %vm1174_vm14, %v1263_v4, %v1259_v54 }
 0x292   : > { %v4599_v0 = vpop.permute.xlu0 %1086  ;;  %v4601_v29 = vpop.permute.xlu1 %1041 }
 0x293   : > { %v1268_v2 = vrot.slane %v4599_v0, %v4617_v5  ;;  %v1187_v44 = vrot.slane %v4601_v29, %v4620_v49  ;;  %v1175_v0 = vsel %vm1174_vm14, %v1173_v23, %v1168_v40  ;;  %v4711_v23 = vld [vmem:[#allocation3] sm:$0x3] }
 0x295   : > { %v1269_v8 = vsel %vm5407_vm15, %v1268_v2, %v1264_v46 }
 0x296   : > { %v1090_v48 = vpop.permute.xlu0 %1089  ;;  %v1045_v22 = vpop.permute.xlu1 %1044 }
 0x297   : > { %v1273_v14 = vrot.slane %v1090_v48, %v4620_v49  ;;  %v1194_v28 = vrot.slane %v1045_v22, %v4629_v34  ;;  %v1182_v48 = vsel %vm5407_vm15, %v1180_v60, %v1175_v0  ;;  %vm1295_vm15 = vcmask 1041408  }
 0x298   : > { %v1189_v22 = vsel %vm1188_vm0, %v1187_v44, %v1182_v48 }
 0x299   : > { %v1274_v51 = vsel %vm1188_vm0, %v1273_v14, %v1269_v8  ;;  %v1196_v24 = vsel %vm5408_vm1, %v1194_v28, %v1189_v22 }
 0x29a   : > { %v1093_v35 = vpop.permute.xlu0 %1092  ;;  %v1048_v39 = vpop.permute.xlu1 %1047 }
 0x29b   : > { %v1278_v38 = vrot.slane %v1093_v35, %v4629_v34  ;;  %v1201_v50 = vrot.slane %v1048_v39, %v4636_v41 }
 0x29d   : > { %v1279_v35 = vsel %vm5408_vm1, %v1278_v38, %v1274_v51  ;;  %v1203_v21 = vsel %vm1202_vm2, %v1201_v50, %v1196_v24  ;;  %vm5409_vm1 = vcmask 1024  }
 0x29e   : > { %v1096_v32 = vpop.permute.xlu0 %1095  ;;  %v1051_v45 = vpop.permute.xlu1 %1050 }
 0x29f   : > { %v1283_v29 = vrot.slane %v1096_v32, %v4636_v41  ;;  %v1208_v17 = vrot.slane %v1051_v45, %v4639_v43 }
 0x2a1   : > { %v1284_v30 = vsel %vm1202_vm2, %v1283_v29, %v1279_v35  ;;  %v1210_v7 = vsel %vm1209_vm3, %v1208_v17, %v1203_v21  ;;  %v5472_v35 = vld [vmem:[#allocation46_spill] sm:$0xff] }
 0x2a2   : > { %v1099_v25 = vpop.permute.xlu0 %1098 }
 0x2a3   : > { %v1288_v39 = vrot.slane %v1099_v25, %v4639_v43 }
 0x2a5   : > { %v1289_v6 = vsel %vm1209_vm3, %v1288_v39, %v1284_v30  ;;  %v5473_v30 = vld [vmem:[#allocation53_spill] sm:$0xff] }
 0x2a6   : > { %v1291_v15 = vsel %vm1290_vm4, %v1289_v6, %v1210_v7 }
 0x2a7   : > { %v1296_v52 = vsel %vm1295_vm15, %v1291_v15, -inf  ;;  %1293 = vst [vmem:[%s4237_s25] sm:$0x3] %v1291_v15  ;;  %v5474_v15 = vld [vmem:[#allocation47_spill] sm:$0xff] }
 0x2a8   : > { %1297 = vmax.xlane.f32.xlu1 %v1296_v52 }
 0x335   : > { %v1298_v4 = vpop.xlane.xlu1 %1297 }
 0x336   : > { %v4714_v16 = vmax.f32 %v4711_v23, %v1298_v4 }
 0x338   : > { %v1300_v59 = vsub.f32 %v4711_v23, %v4714_v16  ;;  %1866 = vst.msk [vmem:[#allocation3] sm:$0x3] %vm5409_vm1, %v4714_v16  ;;  %1305 = vperm.xlu0 %3771, %v4714_v16   ;;  %v5514_v23 = vld [vmem:[#allocation39_spill] sm:$0xff]  ;;  %v5515_v16 = vld [vmem:[#allocation40_spill] sm:$0xff]  ;;  %vm3941_vm1 = vmmov 0  }
 0x3b7   : > { %v1306_v60 = vpop.permute.xlu0 %1305 }
 0x3b8   : > { %v4722_v2 = vrot.slane %v1306_v60, %v4265_v57  ;;  %v4726_v56 = vrot.slane %v1306_v60, %v5471_v37  ;;  %v5475_v60 = vld [vmem:[#allocation55_spill] sm:$0xff] }
 0x3ba   : > { %v1333_v44 = vsub.f32 %v4415_v11, %v4726_v56  ;;  %v1320_v14 = vsub.f32 %v4424_v61, %v4722_v2  ;;  %v1334_v32 = vsub.f32 %v4420_v9, %v4726_v56  ;;  %v1323_v45 = vsub.f32 %v4442_v55, %v4722_v2 }
 0x3bb   : > { %v1335_v53 = vsub.f32 %v4426_v47, %v4726_v56  ;;  %v1324_v11 = vsub.f32 %v4448_v58, %v4722_v2  ;;  %v1317_v9 = vsub.f32 %v4409_v13, %v4722_v2  ;;  %v1325_v55 = vsub.f32 %v4455_v62, %v4722_v2 }
 0x3bc   : > { %v1381_v40 = vmul.f32 1.442695, %v1333_v44  ;;  %v1355_v54 = vmul.f32 1.442695, %v1320_v14  ;;  %v1383_v57 = vmul.f32 1.442695, %v1334_v32  ;;  %v1318_v47 = vsub.f32 %v4411_v12, %v4722_v2 }
 0x3bd   : > { %v1361_v28 = vmul.f32 1.442695, %v1323_v45  ;;  %v1385_v61 = vmul.f32 1.442695, %v1335_v53  ;;  %v1363_v38 = vmul.f32 1.442695, %v1324_v11  ;;  %v1326_v58 = vsub.f32 %v4463_v63, %v4722_v2 }
 0x3be   : > { %3773 = vpow2.f32 %v1381_v40  ;;  %v1349_v0 = vmul.f32 1.442695, %v1317_v9  ;;  %v1365_v46 = vmul.f32 1.442695, %v1325_v55  ;;  %v1351_v13 = vmul.f32 1.442695, %v1318_v47 }
 0x3bf   : > { %3775 = vpow2.f32 %v1355_v54  ;;  %v1336_v48 = vsub.f32 %v4432_v27, %v4726_v56  ;;  %v1367_v62 = vmul.f32 1.442695, %v1326_v58  ;;  %v1327_v8 = vsub.f32 %v4471_v33, %v4722_v2  ;;  %v5476_v45 = vld [vmem:[#allocation44_spill] sm:$0xff]  ;;  %v5479_v58 = vld [vmem:[#allocation45_spill] sm:$0xff] }
 0x3c0   : > { %3777 = vpow2.f32 %v1383_v57  ;;  %v1319_v22 = vsub.f32 %v4418_v26, %v4722_v2  ;;  %v1328_v25 = vsub.f32 %v4479_v36, %v4722_v2  ;;  %v1337_v39 = vsub.f32 %v5472_v35, %v4726_v56  ;;  %v5477_v57 = vld [vmem:[#allocation57_spill] sm:$0xff]  ;;  %v5478_v9 = vld [vmem:[#allocation48_spill] sm:$0xff] }
 0x3c1   : > { %3779 = vpow2.f32 %v1361_v28  ;;  %v1387_v63 = vmul.f32 1.442695, %v1336_v48  ;;  %v1369_v51 = vmul.f32 1.442695, %v1327_v8  ;;  %v1329_v7 = vsub.f32 %v5473_v30, %v4722_v2  ;;  %v5483_v30 = vld [vmem:[#allocation52_spill] sm:$0xff] }
 0x3c2   : > { %3781 = vpow2.f32 %v1385_v61  ;;  %v1353_v33 = vmul.f32 1.442695, %v1319_v22  ;;  %v1371_v21 = vmul.f32 1.442695, %v1328_v25  ;;  %v1389_v36 = vmul.f32 1.442695, %v1337_v39 }
 0x3c3   : > { %3783 = vpow2.f32 %v1363_v38  ;;  %v1338_v52 = vsub.f32 %v5474_v15, %v4726_v56  ;;  %v1373_v4 = vmul.f32 1.442695, %v1329_v7  ;;  %v1330_v37 = vsub.f32 %v5475_v60, %v4722_v2  ;;  %v5481_v22 = vld [vmem:[#allocation50_spill] sm:$0xff]  ;;  %v5485_v60 = vld [vmem:[#allocation56_spill] sm:$0xff] }
 0x3c4   : > { %3785 = vpow2.f32 %v1349_v0  ;;  %v1321_v40 = vsub.f32 %v5476_v45, %v4722_v2  ;;  %v1331_v53 = vsub.f32 %v5477_v57, %v4722_v2  ;;  %v1339_v38 = vsub.f32 %v5478_v9, %v4726_v56  ;;  %v5486_v45 = vld [vmem:[#allocation58_spill] sm:$0xff]  ;;  %v5488_v57 = vld [vmem:[#allocation28_spill] sm:$0xff] }
 0x3c5   : > { %3787 = vpow2.f32 %v1365_v46  ;;  %v1391_v32 = vmul.f32 1.442695, %v1338_v52  ;;  %v1375_v54 = vmul.f32 1.442695, %v1330_v37  ;;  %v1343_v7 = vsub.f32 %v5483_v30, %v4726_v56 }
 0x3c6   : > { %3789 = vpow2.f32 %v1351_v13  ;;  %v1357_v61 = vmul.f32 1.442695, %v1321_v40  ;;  %v1377_v55 = vmul.f32 1.442695, %v1331_v53  ;;  %v1393_v46 = vmul.f32 1.442695, %v1339_v38 }
 0x3c7   : > { %3791 = vpow2.f32 %v1367_v62  ;;  %v5480_v62 = vld [vmem:[#allocation49_spill] sm:$0xff]  ;;  %v1345_v37 = vsub.f32 %v5485_v60, %v4726_v56  ;;  %v1346_v40 = vsub.f32 %v5486_v45, %v4726_v56  ;;  %v5490_v38 = vld [vmem:[#allocation11_spill] sm:$0xff] }
 0x3c8   : > { %v3774_v50 = vpop.eup %3773  ;;  %3793 = vpow2.f32 %v1387_v63  ;;  %v1340_v8 = vsub.f32 %v5480_v62, %v4726_v56  ;;  %v5495_v62 = vld [vmem:[#allocation13_spill] sm:$0xff] }
 0x3c9   : > { %v3776_v29 = vpop.eup %3775  ;;  %1496 = vperm.xlu0 %3771, %v3774_v50   ;;  %3795 = vpow2.f32 %v1369_v51  ;;  %v1322_v50 = vsub.f32 %v5479_v58, %v4722_v2  ;;  %v1341_v51 = vsub.f32 %v5481_v22, %v4726_v56 }
 0x3ca   : > { %1457 = vperm.xlu1 %3772, %v3776_v29   ;;  %v3778_v12 = vpop.eup %3777  ;;  %3797 = vpow2.f32 %v1353_v33  ;;  %v1395_v63 = vmul.f32 1.442695, %v1340_v8  ;;  %v5482_v33 = vld [vmem:[#allocation51_spill] sm:$0xff]  ;;  %v5496_v8 = vld [vmem:[#allocation14_spill] sm:$0xff] }
 0x3cb   : > { %v3780_v17 = vpop.eup %3779  ;;  %3799 = vpow2.f32 %v1371_v21  ;;  %v1359_v48 = vmul.f32 1.442695, %v1322_v50  ;;  %v1342_v35 = vsub.f32 %v5482_v33, %v4726_v56  ;;  %v5501_v33 = vld [vmem:[#allocation16_spill] sm:$0xff] }
 0x3cc   : > { %v3782_v27 = vpop.eup %3781  ;;  %3801 = vpow2.f32 %v1389_v36  ;;  %v5484_v36 = vld [vmem:[#allocation54_spill] sm:$0xff] }
 0x3cd   : > { %1499 = vperm.xlu0 %3771, %v3778_v12   ;;  %v3784_v24 = vpop.eup %3783  ;;  %3803 = vpow2.f32 %v1373_v4  ;;  %v1399_v21 = vmul.f32 1.442695, %v1342_v35  ;;  %v1344_v15 = vsub.f32 %v5484_v36, %v4726_v56 }
 0x3ce   : > { %1466 = vperm.xlu1 %3772, %v3780_v17   ;;  %v3786_v26 = vpop.eup %3785  ;;  %3805 = vpow2.f32 %v1391_v32  ;;  %v1405_v32 = vmul.f32 1.442695, %v1345_v37  ;;  %v1301_v37 = vmul.f32 1.442695, %v1300_v59  ;;  %v3646_v59 = vpack.c.bf16 %v5515_v16, %v5514_v23 }
 0x3cf   : > { %v3788_v6 = vpop.eup %3787  ;;  %3807 = vpow2.f32 %v1375_v54  ;;  %v1403_v4 = vmul.f32 1.442695, %v1344_v15  ;;  %v5487_v54 = vld [vmem:[#allocation27_spill] sm:$0xff] }
 0x3d0   : > { %v3790_v44 = vpop.eup %3789  ;;  %3809 = vpow2.f32 %v1357_v61  ;;  %v3628_v53 = vpack.c.bf16 %v5488_v57, %v5487_v54  ;;  %v5489_v61 = vld [vmem:[#allocation60_spill] sm:$0xff]  ;;  %v5506_v15 = vld [vmem:[#allocation35_spill] sm:$0xff]  ;;  %v5511_v54 = vld [vmem:[#allocation38_spill] sm:$0xff] }
 0x3d1   : > { %1502 = vperm.xlu0 %3771, %v3782_v27   ;;  %v3792_v14 = vpop.eup %3791  ;;  %3811 = vpow2.f32 %v1377_v55  ;;  %v1347_v9 = vsub.f32 %v5489_v61, %v4726_v56  ;;  %v5491_v55 = vld [vmem:[#allocation12_spill] sm:$0xff] }
 0x3d2   : > { %1469 = vperm.xlu1 %3772, %v3784_v24   ;;  %v3794_v28 = vpop.eup %3793  ;;  %3813 = vpow2.f32 %v1393_v46  ;;  %v1397_v24 = vmul.f32 1.442695, %v1341_v51  ;;  %v5493_v46 = vld [vmem:[#allocation30_spill] sm:$0xff] }
 0x3d3   : > { %v3796_v11 = vpop.eup %3795  ;;  %3815 = vpow2.f32 %v1359_v48 }
 0x3d4   : > { %v3798_v0 = vpop.eup %3797  ;;  %3817 = vpow2.f32 %v1395_v63  ;;  %v5498_v63 = vld [vmem:[#allocation32_spill] sm:$0xff] }
 0x3d5   : > { %1448 = vperm.xlu0 %3771, %v3786_v26   ;;  %v3800_v47 = vpop.eup %3799  ;;  %3819 = vpow2.f32 %v1397_v24 }
 0x3d6   : > { %1472 = vperm.xlu1 %3772, %v3788_v6   ;;  %v3802_v29 = vpop.eup %3801  ;;  %3821 = vpow2.f32 %v1399_v21  ;;  %v1401_v6 = vmul.f32 1.442695, %v1343_v7  ;;  %v5503_v21 = vld [vmem:[#allocation34_spill] sm:$0xff] }
 0x3d7   : > { %v3804_v13 = vpop.eup %3803 }
 0x3d8   : > { %v3806_v12 = vpop.eup %3805  ;;  %3823 = vpow2.f32 %v1401_v6  ;;  %v5505_v6 = vld [vmem:[#allocation18_spill] sm:$0xff] }
 0x3d9   : > { %1451 = vperm.xlu0 %3771, %v3790_v44   ;;  %v3808_v17 = vpop.eup %3807  ;;  %3825 = vpow2.f32 %v1403_v4 }
 0x3da   : > { %1475 = vperm.xlu1 %3772, %v3792_v14   ;;  %v3810_v25 = vpop.eup %3809  ;;  %v3940_v14 = vmov 0.0|0.0   ;;  %3827 = vpow2.f32 %v1405_v32  ;;  %v5509_v32 = vld [vmem:[#allocation20_spill] sm:$0xff] }
 0x3db   : > { %v3812_v27 = vpop.eup %3811  ;;  %3627 = vmatprep.subr.bf16.mxu1 %v3940_v14  ;;  %3603 = vmatprep.subr.bf16.mxu0 %v3940_v14 }
 0x3dc   : > { %v3814_v39 = vpop.eup %3813  ;;  %3629 = vmatpush3.bf16.msra.mxu1 %v3628_v53 }
 0x3dd   : > { %1505 = vperm.xlu0 %3771, %v3794_v28   ;;  %v3816_v26 = vpop.eup %3815  ;;  %3630 = vmatprep.subr.bf16.mxu1 %v3940_v14 }
 0x3de   : > { %1478 = vperm.xlu1 %3772, %v3796_v11   ;;  %v3818_v52 = vpop.eup %3817  ;;  %v1407_v11 = vmul.f32 1.442695, %v1346_v40  ;;  %v5510_v40 = vld [vmem:[#allocation37_spill] sm:$0xff] }
 0x3df   : > { %v3820_v44 = vpop.eup %3819  ;;  %v3643_v57 = vpack.c.bf16 %v5511_v54, %v5510_v40 }
 0x3e0   : > { %v3822_v28 = vpop.eup %3821  ;;  %3829 = vpow2.f32 %v1407_v11  ;;  %v5513_v11 = vld [vmem:[#allocation22_spill] sm:$0xff] }
 0x3e1   : > { %1454 = vperm.xlu0 %3771, %v3798_v0   ;;  %v3604_v0 = vpack.c.bf16 %v5491_v55, %v5490_v38  ;;  %v5516_v38 = vld [vmem:[#allocation23_spill] sm:$0xff]  ;;  %v5517_v55 = vld [vmem:[#allocation24_spill] sm:$0xff] }
 0x3e2   : > { %1481 = vperm.xlu1 %3772, %v3800_v47   ;;  %v5492_v47 = vld [vmem:[#allocation29_spill] sm:$0xff]  ;;  %v3824_v50 = vpop.eup %3823 }
 0x3e3   : > { %v3631_v58 = vpack.c.bf16 %v5493_v46, %v5492_v47  ;;  %3605 = vmatpush3.bf16.msra.mxu0 %v3604_v0  ;;  %v3826_v51 = vpop.eup %3825  ;;  %v3622_v0 = vpack.c.bf16 %v5517_v55, %v5516_v38  ;;  %v5518_v47 = vld [vmem:[#allocation41_spill] sm:$0xff]  ;;  %v5519_v46 = vld [vmem:[#allocation42_spill] sm:$0xff] }
 0x3e4   : > { %3606 = vmatprep.subr.bf16.mxu0 %v3940_v14  ;;  %v3828_v7 = vpop.eup %3827 }
 0x3e5   : > { %1508 = vperm.xlu0 %3771, %v3802_v29   ;;  %v1409_v29 = vmul.f32 1.442695, %v1347_v9  ;;  %3632 = vmatpush3.bf16.msra.mxu1 %v3631_v58  ;;  %v3649_v58 = vpack.c.bf16 %v5519_v46, %v5518_v47 }
 0x3e6   : > { %1484 = vperm.xlu1 %3772, %v3804_v13   ;;  %v5494_v13 = vld [vmem:[#allocation61_spill] sm:$0xff]  ;;  %3633 = vmatprep.subr.bf16.mxu1 %v3940_v14 }
 0x3e7   : > { %v1348_v48 = vsub.f32 %v5494_v13, %v4726_v56  ;;  %3831 = vpow2.f32 %v1409_v29  ;;  %v5500_v56 = vld [vmem:[#allocation15_spill] sm:$0xff]  ;;  %v5520_v13 = vld [vmem:[#allocation25_spill] sm:$0xff] }
 0x3e8   : > { %v3610_v35 = vpack.c.bf16 %v5501_v33, %v5500_v56 }
 0x3e9   : > { %1511 = vperm.xlu0 %3771, %v3806_v12   ;;  %v3607_v12 = vpack.c.bf16 %v5496_v8, %v5495_v62 }
 0x3ea   : > { %1487 = vperm.xlu1 %3772, %v3808_v17   ;;  %v5497_v17 = vld [vmem:[#allocation31_spill] sm:$0xff]  ;;  %v3830_v60 = vpop.eup %3829 }
 0x3eb   : > { %v3634_v22 = vpack.c.bf16 %v5498_v63, %v5497_v17  ;;  %3608 = vmatpush3.bf16.msra.mxu0 %v3607_v12 }
 0x3ec   : > { %3609 = vmatprep.subr.bf16.mxu0 %v3940_v14 }
 0x3ed   : > { %1460 = vperm.xlu0 %3771, %v3810_v25   ;;  %v1411_v25 = vmul.f32 1.442695, %v1348_v48  ;;  %3635 = vmatpush3.bf16.msra.mxu1 %v3634_v22  ;;  %v5521_v48 = vld [vmem:[#allocation26_spill] sm:$0xff] }
 0x3ee   : > { %1490 = vperm.xlu1 %3772, %v3812_v27   ;;  %v5499_v27 = vld [vmem:[#allocation59_spill] sm:$0xff]  ;;  %3636 = vmatprep.subr.bf16.mxu1 %v3940_v14  ;;  %v3625_v62 = vpack.c.bf16 %v5521_v48, %v5520_v13 }
 0x3ef   : > { %v1332_v24 = vsub.f32 %v5499_v27, %v4722_v2  ;;  %3611 = vmatpush3.bf16.msra.mxu0 %v3610_v35  ;;  %3833 = vpow2.f32 %v1411_v25  ;;  %v5504_v2 = vld [vmem:[#allocation17_spill] sm:$0xff] }
 0x3f0   : > { %3612 = vmatprep.subr.bf16.mxu0 %v3940_v14  ;;  %v3613_v36 = vpack.c.bf16 %v5505_v6, %v5504_v2  ;;  %v5522_v6 = vld [vmem:[#allocation62_spill] sm:$0xff] }
 0x3f1   : > { %1514 = vperm.xlu0 %3771, %v3814_v39   ;;  %v5502_v39 = vld [vmem:[#allocation33_spill] sm:$0xff]  ;;  %v3832_v53 = vpop.eup %3831 }
 0x3f2   : > { %v3637_v30 = vpack.c.bf16 %v5503_v21, %v5502_v39 }
 0x3f3   : > { %3614 = vmatpush3.bf16.msra.mxu0 %v3613_v36 }
 0x3f4   : > { %3638 = vmatpush3.bf16.msra.mxu1 %v3637_v30  ;;  %3615 = vmatprep.subr.bf16.mxu0 %v3940_v14 }
 0x3f5   : > { %1463 = vperm.xlu0 %3771, %v3816_v26   ;;  %v1379_v26 = vmul.f32 1.442695, %v1332_v24  ;;  %3639 = vmatprep.subr.bf16.mxu1 %v3940_v14 }
 0x3f7   : > { %3835 = vpow2.f32 %v1379_v26 }
 0x3f8   : > { %3837 = vpow2.f32 %v1301_v37 }
 0x3f9   : > { %1517 = vperm.xlu0 %3771, %v3818_v52   ;;  %v5507_v52 = vld [vmem:[#allocation36_spill] sm:$0xff]  ;;  %v3834_v9 = vpop.eup %3833 }
 0x3fa   : > { %v3640_v4 = vpack.c.bf16 %v5507_v52, %v5506_v15 }
 0x3fc   : > { %3641 = vmatpush3.bf16.msra.mxu1 %v3640_v4 }
 0x3fd   : > { %1520 = vperm.xlu0 %3771, %v3820_v44   ;;  %3642 = vmatprep.subr.bf16.mxu1 %v3940_v14  ;;  %v5508_v44 = vld [vmem:[#allocation19_spill] sm:$0xff] }
 0x3fe   : > { %v3616_v45 = vpack.c.bf16 %v5509_v32, %v5508_v44  ;;  %v5523_v44 = vld [vmem:[#allocation64_spill] sm:$0xff] }
 0x400   : > { %3617 = vmatpush3.bf16.msra.mxu0 %v3616_v45  ;;  %3644 = vmatpush3.bf16.msra.mxu1 %v3643_v57  ;;  %v5524_v45 = vld [vmem:[#allocation63_spill] sm:$0xff] }
 0x401   : > { %1523 = vperm.xlu0 %3771, %v3822_v28   ;;  %v5512_v28 = vld [vmem:[#allocation21_spill] sm:$0xff]  ;;  %3618 = vmatprep.subr.bf16.mxu0 %v3940_v14  ;;  %v3836_v29 = vpop.eup %3835 }
 0x402   : > { %v3619_v61 = vpack.c.bf16 %v5513_v11, %v5512_v28  ;;  %3645 = vmatprep.subr.bf16.mxu1 %v3940_v14  ;;  %v4843_v8 = vpop.eup %3837 }
 0x404   : > { %3620 = vmatpush3.bf16.msra.mxu0 %v3619_v61  ;;  %3647 = vmatpush3.bf16.msra.mxu1 %v3646_v59 }
 0x405   : > { %1526 = vperm.xlu0 %3771, %v3824_v50   ;;  %3621 = vmatprep.subr.bf16.mxu0 %v3940_v14  ;;  %v3942_v50 = vmov 0.0  }
 0x406   : > { %3648 = vmatprep.subr.bf16.mxu1 %v3940_v14  ;;  %3517 = vmatprep.mubr.msk.f32.mxu1 %vm3941_vm1, %v3942_v50 }
 0x407   : > { %3482 = vmatprep.mubr.msk.f32.mxu0 %vm3941_vm1, %v3942_v50 }
 0x408   : > { %3623 = vmatpush3.bf16.msra.mxu0 %v3622_v0  ;;  %3650 = vmatpush3.bf16.msra.mxu1 %v3649_v58 }
 0x409   : > { %1529 = vperm.xlu0 %3771, %v3826_v51   ;;  %3624 = vmatprep.subr.bf16.mxu0 %v3940_v14 }
 0x40c   : > { %3626 = vmatpush3.bf16.msra.mxu0 %v3625_v62 }
 0x40d   : > { %1532 = vperm.xlu0 %3771, %v3828_v7  }
 0x411   : > { %1535 = vperm.xlu0 %3771, %v3830_v60  }
 0x415   : > { %1538 = vperm.xlu0 %3771, %v3832_v53  }
 0x419   : > { %1541 = vperm.xlu0 %3771, %v3834_v9  }
 0x41d   : > { %1493 = vperm.xlu0 %3771, %v3836_v29  }
 0x421   : > { %1712 = vperm.xlu0 %3771, %v4843_v8  }
 0x448   : > { %v1497_v12 = vpop.permute.xlu0 %1496 }
 0x449   : > { %v1458_v24 = vpop.permute.xlu1 %1457  ;;  %v1625_v50 = vrot.slane %v1497_v12, %v4566_v18 }
 0x44a   : > { %v1560_v40 = vrot.slane %v1458_v24, %v5524_v45 }
 0x44c   : > { %v1500_v17 = vpop.permute.xlu0 %1499 }
 0x44d   : > { %v1467_v35 = vpop.permute.xlu1 %1466  ;;  %v1629_v0 = vrot.slane %v1500_v17, %v4569_v1 }
 0x44e   : > { %v1575_v23 = vrot.slane %v1467_v35, %v4588_v3 }
 0x450   : > { %v1503_v63 = vpop.permute.xlu0 %1502 }
 0x451   : > { %v1470_v21 = vpop.permute.xlu1 %1469  ;;  %v1634_v46 = vrot.slane %v1503_v63, %v5522_v6 }
 0x452   : > { %v1580_v9 = vrot.slane %v1470_v21, %v4591_v10 }
 0x454   : > { %v1449_v22 = vpop.permute.xlu0 %1448 }
 0x455   : > { %v1473_v7 = vpop.permute.xlu1 %1472  ;;  %v1546_v15 = vrot.slane %v1449_v22, %v4566_v18  ;;  %v1630_v22 = vsel %vm1111_vm5, %v1629_v0, %v1625_v50 }
 0x456   : > { %v1585_v58 = vrot.slane %v1473_v7, %v4594_v19  ;;  %v1635_v63 = vsel %vm1118_vm6, %v1634_v46, %v1630_v22 }
 0x458   : > { %v1452_v51 = vpop.permute.xlu0 %1451 }
 0x459   : > { %v1550_v2 = vrot.slane %v1452_v51, %v4569_v1  ;;  %v1476_v52 = vpop.permute.xlu1 %1475 }
 0x45a   : > { %v1590_v51 = vrot.slane %v1476_v52, %v4597_v42 }
 0x45b   : > { %v1551_v60 = vsel %vm1111_vm5, %v1550_v2, %v1546_v15  ;;  %vm5525_vm5 = vcmask 786112  }
 0x45c   : > { %v1506_v25 = vpop.permute.xlu0 %1505 }
 0x45d   : > { %v1479_v53 = vpop.permute.xlu1 %1478  ;;  %v1639_v29 = vrot.slane %v1506_v25, %v5524_v45 }
 0x45e   : > { %v1595_v24 = vrot.slane %v1479_v53, %v4610_v31 }
 0x45f   : > { %v1640_v18 = vsel %vm1125_vm7, %v1639_v29, %v1635_v63 }
 0x460   : > { %v1455_v27 = vpop.permute.xlu0 %1454 }
 0x461   : > { %v1555_v36 = vrot.slane %v1455_v27, %v5522_v6  ;;  %v1482_v38 = vpop.permute.xlu1 %1481 }
 0x463   : > { %v1556_v37 = vsel %vm1118_vm6, %v1555_v36, %v1551_v60  ;;  %vm5526_vm6 = vmmov %vm5525_vm5 }
 0x464   : > { %v1509_v56 = vpop.permute.xlu0 %1508  ;;  %v1561_v28 = vsel %vm1125_vm7, %v1560_v40, %v1556_v37  ;;  %vm5527_vm7 = vcmask 917312  }
 0x465   : > { %v1644_v13 = vrot.slane %v1509_v56, %v5523_v44  ;;  %v1485_v1 = vpop.permute.xlu1 %1484 }
 0x466   : > { %v1605_v15 = vrot.slane %v1485_v1, %v4620_v49 }
 0x467   : > { %v1645_v56 = vsel %vm1132_vm8, %v1644_v13, %v1640_v18 }
 0x468   : > { %v1512_v33 = vpop.permute.xlu0 %1511 }
 0x469   : > { %v1649_v17 = vrot.slane %v1512_v33, %v4585_v20 }
 0x46b   : > { %v1650_v21 = vsel %vm1139_vm9, %v1649_v17, %v1645_v56 }
 0x46c   : > { %v1461_v39 = vpop.permute.xlu0 %1460 }
 0x46d   : > { %v1565_v32 = vrot.slane %v1461_v39, %v5523_v44 }
 0x46f   : > { %v1566_v11 = vsel %vm1132_vm8, %v1565_v32, %v1561_v28  ;;  %vm5528_vm8 = vmmov %vm5527_vm7 }
 0x470   : > { %v1515_v30 = vpop.permute.xlu0 %1514 }
 0x471   : > { %v1654_v27 = vrot.slane %v1515_v30, %v4588_v3 }
 0x473   : > { %v1655_v33 = vsel %vm1146_vm10, %v1654_v27, %v1650_v21 }
 0x474   : > { %v1464_v14 = vpop.permute.xlu0 %1463 }
 0x475   : > { %v1570_v54 = vrot.slane %v1464_v14, %v4585_v20  ;;  %v1600_v14 = vrot.slane %v1482_v38, %v4617_v5 }
 0x477   : > { %v1571_v61 = vsel %vm1139_vm9, %v1570_v54, %v1566_v11  ;;  %vm5529_vm9 = vcmask 1024  }
 0x478   : > { %v1518_v26 = vpop.permute.xlu0 %1517  ;;  %v1576_v59 = vsel %vm1146_vm10, %v1575_v23, %v1571_v61  ;;  %vm1864_vm10 = vcmask 254976  }
 0x479   : > { %v1581_v47 = vsel %vm1153_vm11, %v1580_v9, %v1576_v59  ;;  %v1659_v25 = vrot.slane %v1518_v26, %v4591_v10  ;;  %v1488_v10 = vpop.permute.xlu1 %1487  ;;  %v1413_v9 = vld [vmem:[#allocation4] sm:$0x3] }
 0x47a   : > { %v1586_v48 = vsel %vm1160_vm12, %v1585_v58, %v1581_v47  ;;  %v1610_v32 = vrot.slane %v1488_v10, %v4629_v34  ;;  %v1414_v38 = vmul.f32 %v4843_v8, %v1413_v9  ;;  %v1709_v47 = vld [vmem:[#allocation5] sm:$0x3] }
 0x47b   : > { %v1591_v12 = vsel %vm1167_vm13, %v1590_v51, %v1586_v48  ;;  %v1660_v7 = vsel %vm1153_vm11, %v1659_v25, %v1655_v33 }
 0x47c   : > { %v1521_v4 = vpop.permute.xlu0 %1520  ;;  %v1596_v30 = vsel %vm1174_vm14, %v1595_v24, %v1591_v12 }
 0x47d   : > { %v1664_v35 = vrot.slane %v1521_v4, %v4594_v19  ;;  %v1491_v45 = vpop.permute.xlu1 %1490 }
 0x47e   : > { %v1615_v28 = vrot.slane %v1491_v45, %v4636_v41 }
 0x47f   : > { %v1665_v19 = vsel %vm1160_vm12, %v1664_v35, %v1660_v7 }
 0x480   : > { %v1524_v57 = vpop.permute.xlu0 %1523 }
 0x481   : > { %v1669_v20 = vrot.slane %v1524_v57, %v4597_v42 }
 0x483   : > { %v1670_v42 = vsel %vm1167_vm13, %v1669_v20, %v1665_v19 }
 0x484   : > { %v1527_v16 = vpop.permute.xlu0 %1526 }
 0x485   : > { %v1674_v3 = vrot.slane %v1527_v16, %v4610_v31  ;;  %v1601_v31 = vsel %vm5525_vm5, %v1600_v14, %v1596_v30 }
 0x486   : > { %v1606_v44 = vsel %vm1188_vm0, %v1605_v15, %v1601_v31 }
 0x487   : > { %v1675_v52 = vsel %vm1174_vm14, %v1674_v3, %v1670_v42  ;;  %v1611_v53 = vsel %vm5528_vm8, %v1610_v32, %v1606_v44 }
 0x488   : > { %v1530_v55 = vpop.permute.xlu0 %1529  ;;  %v1616_v23 = vsel %vm1202_vm2, %v1615_v28, %v1611_v53 }
 0x489   : > { %v1679_v26 = vrot.slane %v1530_v55, %v4617_v5 }
 0x48b   : > { %v1680_v60 = vsel %vm5526_vm6, %v1679_v26, %v1675_v52 }
 0x48c   : > { %v1533_v62 = vpop.permute.xlu0 %1532 }
 0x48d   : > { %v1684_v2 = vrot.slane %v1533_v62, %v4620_v49 }
 0x48f   : > { %v1685_v5 = vsel %vm1188_vm0, %v1684_v2, %v1680_v60 }
 0x490   : > { %v1536_v39 = vpop.permute.xlu0 %1535 }
 0x491   : > { %v1689_v36 = vrot.slane %v1536_v39, %v4629_v34 }
 0x493   : > { %v1690_v40 = vsel %vm5527_vm7, %v1689_v36, %v1685_v5 }
 0x494   : > { %v1539_v6 = vpop.permute.xlu0 %1538 }
 0x495   : > { %v1694_v4 = vrot.slane %v1539_v6, %v4636_v41 }
 0x497   : > { %v1695_v49 = vsel %vm1202_vm2, %v1694_v4, %v1690_v40 }
 0x498   : > { %v1542_v37 = vpop.permute.xlu0 %1541 }
 0x499   : > { %v1699_v54 = vrot.slane %v1542_v37, %v4639_v43 }
 0x49b   : > { %v1700_v57 = vsel %vm1209_vm3, %v1699_v54, %v1695_v49 }
 0x49c   : > { %3518 = vmatmul.mubr.f32.vlgmr.msra.gmra.mrb[0].mxu1 %v1700_v57  ;;  %v1494_v11 = vpop.permute.xlu0 %1493 }
 0x49d   : > { %v1620_v61 = vrot.slane %v1494_v11, %v4639_v43 }
 0x49f   : > { %v1621_v34 = vsel %vm1209_vm3, %v1620_v61, %v1616_v23 }
 0x4a0   : > { %3483 = vmatmul.mubr.f32.vlgmr.msra.gmra.mrb[0].mxu0 %v1621_v34  ;;  %v1701_v16 = vsel %vm1290_vm4, %v1700_v57, %v1621_v34  ;;  %v1713_v43 = vpop.permute.xlu0 %1712 }
 0x4a1   : > { %v1703_v59 = vsel %vm1295_vm15, %v1701_v16, 0.0  ;;  %v1715_v50 = vmul.f32 %v1713_v43, %v1709_v47 }
 0x4a2   : > { %1704 = vadd.xlane.f32.xlu1 %v1703_v59 }
 0x52f   : > { %v1705_v55 = vpop.xlane.xlu1 %1704 }
 0x530   : > { %v1706_v0 = vadd.f32 %v1705_v55, %v1414_v38 }
 0x532   : > { %1708 = vst.msk [vmem:[#allocation4] sm:$0x3] %vm5529_vm9, %v1706_v0 }
 0x56f   : > { %v1854_v41 = vpop.f32.mrb[0].mxu1 }
 0x570   : > { %v3519_v46 = vpop.f32.mrb[1].mxu1  ;;  %v1860_v58 = vrot.slane %v1854_v41, 7 }
 0x573   : > { %v1783_v29 = vpop.f32.mrb[0].mxu0 }
 0x574   : > { %v1861_v13 = vsel %vm1290_vm4, %v1860_v58, %v1783_v29  ;;  %v3484_v48 = vpop.f32.mrb[1].mxu0 }
 0x575   : > { %v1863_v62 = vadd.f32 %v1861_v13, %v1715_v50 }
 0x577   : > { %1865 = vst.msk [vmem:[#allocation5] sm:$0x3] %vm1864_vm10, %v1863_v62 }
 0x578 PF: > { %p1867_p13 = scmp.eq.s32.totalorder %s3924_s20, 1 }
 0x579   : > { %v1874_v8 = vld [vmem:[#allocation4] sm:$0x3] (%p1867_p13)  ;;  %v3943_v22 = vmov (%p1867_p13), 0   ;;  %v1883_v1 = vld [vmem:[%s5339_s7 + $0x8] sm:$0xff] (%p1867_p13)  ;;  %v3944_v63 = vmov (%p1867_p13), 0.0|0.0   ;;  %v1884_v12 = vld [vmem:[%s5339_s7 + $0x10] sm:$0xff] (%p1867_p13) }
 0x57a   : > { %1871 = sbr.rel (!%p1867_p13) target bundleno = 2034 (0x7f2), region = 76  ;;  %3839 = vset.pattern.permute.xlu0 (%p1867_p13), %v3943_v22  ;;  %v1882_v51 = vld [vmem:[%s5339_s7] sm:$0xff] (%p1867_p13)  ;;  %3651 = vmatprep.subr.bf16.mxu0 (%p1867_p13), %v3944_v63  ;;  %v3324_v18 = vld [vmem:[%s5339_s7 + $0x28] sm:$0xff] (%p1867_p13)  ;;  %v1885_v25 = vld [vmem:[%s5339_s7 + $0x18] sm:$0xff] (%p1867_p13)  ;;  %vm3945_vm11 = vmmov (%p1867_p13), 0   ;;  %v3946_v39 = vmov (%p1867_p13), 0.0  }
 0x57b   : > { %1877 = vperm.xlu0 (%p1867_p13), %3839, %v1874_v8   ;;  %v3323_v17 = vld [vmem:[%s5339_s7 + $0x20] sm:$0xff] (%p1867_p13)  ;;  %v3652_v27 = vpack.c.bf16 (%p1867_p13), %v1883_v1, %v1882_v51  ;;  %3657 = vmatprep.subr.bf16.mxu1 (%p1867_p13), %v3944_v63  ;;  %v3325_v56 = vld [vmem:[%s5339_s7 + $0x30] sm:$0xff] (%p1867_p13)  ;;  %v3326_v35 = vld [vmem:[%s5339_s7 + $0x38] sm:$0xff] (%p1867_p13)  ;;  %v3655_v21 = vpack.c.bf16 (%p1867_p13), %v1885_v25, %v1884_v12  ;;  %vm1893_vm12 = vcmask (%p1867_p13), 261120   ;;  %vm2488_vm13 = vcmask (%p1867_p13), 254976  }
 0x57c   : > { %v3658_v24 = vpack.c.bf16 (%p1867_p13), %v3324_v18, %v3323_v17  ;;  %3528 = vmatprep.mubr.msk.f32.mxu0 (%p1867_p13), %vm3945_vm11, %v3946_v39  ;;  %3539 = vmatprep.mubr.msk.f32.mxu1 (%p1867_p13), %vm3945_vm11, %v3946_v39  ;;  %v3661_v20 = vpack.c.bf16 (%p1867_p13), %v3326_v35, %v3325_v56  ;;  %v3330_v3 = vld [vmem:[%s5339_s7 + $0x40] sm:$0xff] (%p1867_p13)  ;;  %v3331_v30 = vld [vmem:[%s5339_s7 + $0x48] sm:$0xff] (%p1867_p13)  ;;  %v3332_v6 = vld [vmem:[%s5339_s7 + $0x50] sm:$0xff] (%p1867_p13) }
 0x57d   : > { %3653 = vmatpush3.bf16.msra.mxu0 (%p1867_p13), %v3652_v27  ;;  %v3339_v14 = vld [vmem:[%s5341_s9 + $0x20] sm:$0xff] (%p1867_p13)  ;;  %v3340_v10 = vld [vmem:[%s5341_s9 + $0x28] sm:$0xff] (%p1867_p13)  ;;  %v3664_v19 = vpack.c.bf16 (%p1867_p13), %v3331_v30, %v3330_v3  ;;  %v3333_v36 = vld [vmem:[%s5339_s7 + $0x58] sm:$0xff] (%p1867_p13) }
 0x57e   : > { %3659 = vmatpush3.bf16.msra.mxu1 (%p1867_p13), %v3658_v24  ;;  %3654 = vmatprep.subr.bf16.mxu0 (%p1867_p13), %v3944_v63  ;;  %v1873_v7 = vld [vmem:[#allocation5] sm:$0x3] (%p1867_p13)  ;;  %v3676_v2 = vpack.c.bf16 (%p1867_p13), %v3340_v10, %v3339_v14  ;;  %v3341_v31 = vld [vmem:[%s5341_s9 + $0x30] sm:$0xff] (%p1867_p13)  ;;  %v3342_v15 = vld [vmem:[%s5341_s9 + $0x38] sm:$0xff] (%p1867_p13)  ;;  %v3667_v52 = vpack.c.bf16 (%p1867_p13), %v3333_v36, %v3332_v6 }
 0x57f   : > { %3660 = vmatprep.subr.bf16.mxu1 (%p1867_p13), %v3944_v63  ;;  %v3679_v4 = vpack.c.bf16 (%p1867_p13), %v3342_v15, %v3341_v31  ;;  %v2133_v60 = vld [vmem:[%s5341_s9] sm:$0xff] (%p1867_p13)  ;;  %v2134_v5 = vld [vmem:[%s5341_s9 + $0x8] sm:$0xff] (%p1867_p13)  ;;  %v2135_v40 = vld [vmem:[%s5341_s9 + $0x10] sm:$0xff] (%p1867_p13) }
 0x580   : > { %v3346_v37 = vld [vmem:[%s5341_s9 + $0x40] sm:$0xff] (%p1867_p13)  ;;  %v3347_v44 = vld [vmem:[%s5341_s9 + $0x48] sm:$0xff] (%p1867_p13)  ;;  %v3670_v32 = vpack.c.bf16 (%p1867_p13), %v2134_v5, %v2133_v60  ;;  %v2136_v54 = vld [vmem:[%s5341_s9 + $0x18] sm:$0xff] (%p1867_p13) }
 0x581   : > { %3656 = vmatpush3.bf16.msra.mxu0 %v3655_v21  ;;  %v4995_v45 = vld [vmem:[%s5334_s2] sm:$0x3]  ;;  %v3682_v49 = vpack.c.bf16 %v3347_v44, %v3346_v37  ;;  %v3348_v57 = vld [vmem:[%s5341_s9 + $0x50] sm:$0xff]  ;;  %v3349_v53 = vld [vmem:[%s5341_s9 + $0x58] sm:$0xff]  ;;  %v3673_v28 = vpack.c.bf16 %v2136_v54, %v2135_v40 }
 0x582   : > { %3662 = vmatpush3.bf16.msra.mxu1 %v3661_v20  ;;  %3663 = vmatprep.subr.bf16.mxu0 %v3944_v63  ;;  %v3685_v11 = vpack.c.bf16 %v3349_v53, %v3348_v57  ;;  %v2404_v61 = vld [vmem:[%s5337_s5] sm:$0xff]  ;;  %v2405_v23 = vld [vmem:[%s5337_s5 + $0x8] sm:$0xff]  ;;  %v2406_v34 = vld [vmem:[%s5337_s5 + $0x10] sm:$0xff] }
 0x583   : > { %3675 = vmatprep.subr.bf16.mxu1 %v3944_v63  ;;  %v3688_v16 = vpack.c.bf16 %v2405_v23, %v2404_v61  ;;  %v2407_v59 = vld [vmem:[%s5337_s5 + $0x18] sm:$0xff]  ;;  %v3321_v47 = vld [vmem:[%s5340_s8] ss:$0 sm:$0xff]  ;;  %v3328_v46 = vld [vmem:[%s5340_s8 + $0x1] ss:$0 sm:$0xff] }
 0x584   : > { %v3691_v9 = vpack.c.bf16 %v2407_v59, %v2406_v34  ;;  %v3337_v43 = vld [vmem:[%s5342_s10] ss:$0 sm:$0xff]  ;;  %v3344_v58 = vld [vmem:[%s5342_s10 + $0x1] ss:$0 sm:$0xff]  ;;  %v3351_v12 = vld [vmem:[%s5342_s10 + $0x2] ss:$0 sm:$0xff] }
 0x585   : > { %v3693_v50 = vadd.f32 %v3337_v43, %v3321_v47  ;;  %v3695_v29 = vadd.f32 %v3344_v58, %v3328_v46  ;;  %v3335_v56 = vld [vmem:[%s5340_s8 + $0x2] ss:$0 sm:$0xff] }
 0x5fa   : > { %v1878_v33 = vpop.permute.xlu0 %1877 }
 0x5fb   : > { %3840 = vrcp.f32 %v1878_v33 }
 0x605   : > { %v3841_v26 = vpop.eup %3840 }
 0x606   : > { %v1881_v42 = vmul.f32 %v3841_v26, %v1873_v7  ;;  %v3355_v26 = vld [vmem:[%s5338_s6] ss:$0 sm:$0xff] }
 0x608   : > { %3529 = vmatmul.mubr.msk.f32.vlgmr.msra.gmra.mrb[0].mxu0 %vm1893_vm12, %v1881_v42  ;;  %3540 = vmatmul.mubr.msk.f32.vlgmr.msra.gmra.mrb[0].mxu1 %vm1893_vm12, %v1881_v42 }
 0x609   : > { %3665 = vmatpush3.bf16.msra.mxu0 %v3664_v19  ;;  %3677 = vmatpush3.bf16.msra.mxu1 %v3676_v2 }
 0x60a   : > { %3666 = vmatprep.subr.bf16.mxu0 %v3944_v63  ;;  %3678 = vmatprep.subr.bf16.mxu1 %v3944_v63 }
 0x60b   : > { %3550 = vmatprep.mubr.msk.f32.mxu0 %vm3945_vm11, %v3946_v39  ;;  %3572 = vmatprep.mubr.msk.f32.mxu1 %vm3945_vm11, %v3946_v39 }
 0x60d   : > { %3668 = vmatpush3.bf16.msra.mxu0 %v3667_v52  ;;  %3680 = vmatpush3.bf16.msra.mxu1 %v3679_v4 }
 0x60e   : > { %3669 = vmatprep.subr.bf16.mxu0 %v3944_v63  ;;  %3681 = vmatprep.subr.bf16.mxu1 %v3944_v63 }
 0x610   : > { %3551 = vmatmul.mubr.msk.f32.vlgmr.msra.gmra.mrb[2].mxu0 %vm1893_vm12, %v1881_v42  ;;  %3573 = vmatmul.mubr.msk.f32.vlgmr.msra.gmra.mrb[0].mxu1 %vm1893_vm12, %v4995_v45 }
 0x611   : > { %3671 = vmatpush3.bf16.msra.mxu0 %v3670_v32  ;;  %3561 = vmatprep.mubr.msk.f32.mxu0 %vm3945_vm11, %v3946_v39 }
 0x612   : > { %3672 = vmatprep.subr.bf16.mxu0 %v3944_v63  ;;  %3683 = vmatpush3.bf16.msra.mxu1 %v3682_v49 }
 0x613   : > { %3684 = vmatprep.subr.bf16.mxu1 %v3944_v63  ;;  %3583 = vmatprep.mubr.msk.f32.mxu1 %vm3945_vm11, %v3946_v39 }
 0x615   : > { %3674 = vmatpush3.bf16.msra.mxu0 %v3673_v28 }
 0x616   : > { %3686 = vmatpush3.bf16.msra.mxu1 %v3685_v11  ;;  %3687 = vmatprep.subr.bf16.mxu0 %v3944_v63 }
 0x618   : > { %3562 = vmatmul.mubr.msk.f32.vlgmr.msra.gmra.mrb[0].mxu0 %vm1893_vm12, %v4995_v45 }
 0x619   : > { %3584 = vmatmul.mubr.msk.f32.vlgmr.msra.gmra.mrb[2].mxu1 %vm1893_vm12, %v4995_v45  ;;  %3594 = vmatprep.mubr.msk.f32.mxu0 %vm3945_vm11, %v3946_v39 }
 0x61a   : > { %3689 = vmatpush3.bf16.msra.mxu0 %v3688_v16 }
 0x61b   : > { %3690 = vmatprep.subr.bf16.mxu0 %v3944_v63 }
 0x61e   : > { %3692 = vmatpush3.bf16.msra.mxu0 %v3691_v9 }
 0x6e3   : > { %v2129_v38 = vpop.f32.mrb[2].mxu0  ;;  %v2296_v55 = vpop.f32.mrb[0].mxu1 }
 0x6e4   : > { %v3552_v0 = vpop.f32.mrb[3].mxu0  ;;  %v3574_v41 = vpop.f32.mrb[1].mxu1  ;;  %v3696_v1 = vadd.f32 %v3695_v29, %v2296_v55  ;;  %v2130_v39 = vadd.f32 %v3335_v56, %v2129_v38 }
 0x6e6   : > { %v3354_v17 = vmul.f32 -1.442695, %v3696_v1 }
 0x6eb   : > { %v2213_v13 = vpop.f32.mrb[0].mxu0 }
 0x6ec   : > { %v3694_v48 = vadd.f32 %v3693_v50, %v2213_v13  ;;  %v3563_v62 = vpop.f32.mrb[1].mxu0  ;;  %v2379_v8 = vpop.f32.mrb[2].mxu1 }
 0x6ed   : > { %v3585_v22 = vpop.f32.mrb[3].mxu1  ;;  %v2380_v24 = vadd.f32 %v3351_v12, %v2379_v8 }
 0x6ee   : > { %v3353_v51 = vmul.f32 -1.442695, %v3694_v48 }
 0x6f0   : > { %3842 = vpow2.f32 %v3353_v51 }
 0x6f1   : > { %3844 = vpow2.f32 %v3354_v17 }
 0x6fa   : > { %v3843_v63 = vpop.eup %3842 }
 0x6fb   : > { %v2387_v27 = vadd.f32 1.0, %v3843_v63  ;;  %v3845_v18 = vpop.eup %3844 }
 0x6fc   : > { %v2394_v25 = vadd.f32 1.0, %v3845_v18 }
 0x6fd   : > { %3846 = vrcp.f32 %v2387_v27 }
 0x6fe   : > { %3848 = vrcp.f32 %v2394_v25 }
 0x707   : > { %v3847_v35 = vpop.eup %3846 }
 0x708   : > { %v2397_v21 = vmul.f32 %v3847_v35, %v2380_v24  ;;  %v3849_v33 = vpop.eup %3848 }
 0x709   : > { %v2400_v3 = vsub.f32 1.0, %v3849_v33  ;;  %v2402_v10 = vmul.f32 %v3849_v33, %v4995_v45 }
 0x70a   : > { %v2398_v20 = vadd.f32 %v2397_v21, %v2130_v39 }
 0x70c   : > { %3850 = vtanh.f32 %v2398_v20 }
 0x716   : > { %v3851_v30 = vpop.eup %3850 }
 0x717   : > { %v2401_v14 = vmul.f32 %v3851_v30, %v2400_v3 }
 0x719   : > { %v2403_v7 = vadd.f32 %v2402_v10, %v2401_v14 }
 0x71b   : > { %3595 = vmatmul.mubr.msk.f32.vlgmr.msra.gmra.mrb[4].mxu0 %vm1893_vm12, %v2403_v7 }
 0x7ee   : > { %v2484_v19 = vpop.f32.mrb[4].mxu0 }
 0x7ef   : > { %v2485_v2 = vadd.f32 %v3355_v26, %v2484_v19  ;;  %v3596_v6 = vpop.f32.mrb[5].mxu0 }
 0x7f1   : > { %2489 = vst.msk [vmem:[#allocation2] sm:$0x3] %vm2488_vm13, %v2485_v2 }
 0x7f2 PF: > { %p3357_p0 = scmp.ne.s32.totalorder %s3924_s20, 1 }
 0x7f3   : > { %v2506_v42 = vlaneseq (!%p3357_p0)  ;;  %v3947_v36 = vmov (!%p3357_p0), 1966171168   ;;  %vm2559_vm14 = vcmask (!%p3357_p0), 261120   ;;  %v5530_v32 = vld [vmem:[#allocation13_spill] sm:$0xff] (!%p3357_p0)  ;;  %v5531_v40 = vld [vmem:[#allocation11_spill] sm:$0xff] (!%p3357_p0)  ;;  %v5532_v49 = vld [vmem:[#allocation14_spill] sm:$0xff] (!%p3357_p0) }
 0x7f4   : > { %2492 = sbr.rel (%p3357_p0) target bundleno = 2462 (0x99e), region = 80  ;;  %v2504_v31 = vunpack.c.l.s4 (!%p3357_p0), %v3947_v36  ;;  %v5533_v53 = vld [vmem:[#allocation12_spill] sm:$0xff] (!%p3357_p0)  ;;  %v5535_v9 = vld [vmem:[#allocation15_spill] sm:$0xff] (!%p3357_p0)  ;;  %v5536_v41 = vld [vmem:[#allocation18_spill] sm:$0xff] (!%p3357_p0)  ;;  %vm2994_vm15 = vcmask (!%p3357_p0), 130112   ;;  %vm3001_vm0 = vcmask (!%p3357_p0), 195712  }
 0x7f5   : > { %v5065_v15 = vshrl.u32 (!%p3357_p0), %v2506_v42, 7  ;;  %v5534_v16 = vld [vmem:[#allocation16_spill] sm:$0xff] (!%p3357_p0)  ;;  %v5537_v43 = vld [vmem:[#allocation17_spill] sm:$0xff] (!%p3357_p0)  ;;  %v5539_v48 = vld [vmem:[#allocation19_spill] sm:$0xff] (!%p3357_p0)  ;;  %vm3008_vm1 = vcmask (!%p3357_p0), 261312   ;;  %vm3015_vm2 = vcmask (!%p3357_p0), 326912  }
 0x7f6   : > { %v2505_v52 = vunpack.c.0.s8 (!%p3357_p0), %v2504_v31  ;;  %v5538_v29 = vld [vmem:[#allocation20_spill] sm:$0xff] (!%p3357_p0)  ;;  %v5540_v1 = vld [vmem:[#allocation22_spill] sm:$0xff] (!%p3357_p0)  ;;  %v5541_v63 = vld [vmem:[#allocation21_spill] sm:$0xff] (!%p3357_p0)  ;;  %vm3022_vm3 = vcmask (!%p3357_p0), 392512   ;;  %vm3029_vm4 = vcmask (!%p3357_p0), 458112   ;;  %vm3036_vm5 = vcmask (!%p3357_p0), 523712  }
 0x7f7   : > { %v5069_v5 = vsub.s32 (!%p3357_p0), 0, %v5065_v15  ;;  %v5542_v24 = vld [vmem:[#allocation24_spill] sm:$0xff] (!%p3357_p0)  ;;  %v5543_v35 = vld [vmem:[#allocation23_spill] sm:$0xff] (!%p3357_p0)  ;;  %v5544_v3 = vld [vmem:[#allocation26_spill] sm:$0xff] (!%p3357_p0)  ;;  %vm3043_vm6 = vcmask (!%p3357_p0), 589312   ;;  %vm3050_vm7 = vcmask (!%p3357_p0), 654912  }
 0x7f8   : > { %v3358_v4 = vld.sshfl [vmem:[#allocation2] sm:$0x11 pattern:$0x75316420] (!%p3357_p0)  ;;  %v2508_v60 = vsub.s32 (!%p3357_p0), %v2505_v52, %v5065_v15  ;;  %v5546_v19 = vld [vmem:[#allocation28_spill] sm:$0xff] (!%p3357_p0)  ;;  %v5547_v6 = vld [vmem:[#allocation27_spill] sm:$0xff] (!%p3357_p0) }
 0x7f9   : > { %v2502_v8 = vcombine.high (!%p3357_p0), %v3358_v4, %v3358_v4  ;;  %v5545_v14 = vld [vmem:[#allocation25_spill] sm:$0xff] (!%p3357_p0)  ;;  %vm3057_vm8 = vcmask (!%p3357_p0), 720512   ;;  %vm3064_vm9 = vcmask (!%p3357_p0), 786112   ;;  %vm3071_vm10 = vcmask (!%p3357_p0), 851712  }
 0x7fa   : > { %v2509_v37 = vrot.slane (!%p3357_p0), %v3358_v4, %v2508_v60  ;;  %v5548_v4 = vld [vmem:[#allocation30_spill] sm:$0xff] (!%p3357_p0)  ;;  %vm3078_vm11 = vcmask (!%p3357_p0), 917312   ;;  %vm3085_vm12 = vcmask (!%p3357_p0), 982912   ;;  %vm3092_vm13 = vcmask (!%p3357_p0), 1048512  }
 0x7fb   : > { %v2516_v18 = vrot.slane %v2502_v8, %v2508_v60  ;;  %v5559_v8 = vld [vmem:[#allocation39_spill] sm:$0xff] }
 0x7fc   : > { %v2520_v44 = vrot.slane %v2509_v37, %v5069_v5  ;;  %v5549_v37 = vld [vmem:[#allocation29_spill] sm:$0xff] }
 0x7fd   : > { %v2524_v21 = vrot.slane %v2516_v18, %v5069_v5 }
 0x7fe   : > { %v2529_v45 = vmul.f32 %v2520_v44, %v5530_v32  ;;  %v2527_v54 = vmul.f32 %v2520_v44, %v5531_v40  ;;  %v2530_v57 = vmul.f32 %v2520_v44, %v5532_v49  ;;  %v2528_v28 = vmul.f32 %v2520_v44, %v5533_v53  ;;  %v5550_v40 = vld [vmem:[#allocation32_spill] sm:$0xff]  ;;  %v5551_v49 = vld [vmem:[#allocation31_spill] sm:$0xff] }
 0x7ff   : > { %v2532_v59 = vmul.f32 %v2520_v44, %v5534_v16  ;;  %v2531_v38 = vmul.f32 %v2520_v44, %v5535_v9  ;;  %v2534_v47 = vmul.f32 %v2520_v44, %v5536_v41  ;;  %v2533_v46 = vmul.f32 %v2520_v44, %v5537_v43  ;;  %v5554_v9 = vld [vmem:[#allocation36_spill] sm:$0xff]  ;;  %v5556_v43 = vld [vmem:[#allocation38_spill] sm:$0xff] }
 0x800   : > { %v2566_v11 = vsel %vm2559_vm14, %v2529_v45, 0.0  ;;  %v2560_v61 = vsel %vm2559_vm14, %v2527_v54, 0.0  ;;  %v2569_v23 = vsel %vm2559_vm14, %v2530_v57, 0.0  ;;  %v2563_v34 = vsel %vm2559_vm14, %v2528_v28, 0.0 }
 0x801   : > { %2567 = vadd.xlane.f32.xlu1 %v2566_v11  ;;  %2561 = vadd.xlane.f32.xlu0 %v2560_v61  ;;  %v2575_v55 = vsel %vm2559_vm14, %v2532_v59, 0.0  ;;  %v2572_v0 = vsel %vm2559_vm14, %v2531_v38, 0.0  ;;  %v2581_v58 = vsel %vm2559_vm14, %v2534_v47, 0.0  ;;  %v2578_v50 = vsel %vm2559_vm14, %v2533_v46, 0.0  ;;  %v5552_v11 = vld [vmem:[#allocation34_spill] sm:$0xff] }
 0x802   : > { %v2536_v13 = vmul.f32 %v2520_v44, %v5538_v29  ;;  %v2535_v62 = vmul.f32 %v2520_v44, %v5539_v48  ;;  %v2538_v17 = vmul.f32 %v2520_v44, %v5540_v1  ;;  %v2537_v27 = vmul.f32 %v2520_v44, %v5541_v63  ;;  %v5558_v48 = vld [vmem:[#allocation40_spill] sm:$0xff] }
 0x803   : > { %v2540_v56 = vmul.f32 %v2520_v44, %v5542_v24  ;;  %v2539_v39 = vmul.f32 %v2520_v44, %v5543_v35  ;;  %v2542_v30 = vmul.f32 %v2520_v44, %v5544_v3  ;;  %v2541_v10 = vmul.f32 %v2520_v44, %v5545_v14  ;;  %v5562_v24 = vld [vmem:[#allocation43_spill] sm:$0xff] }
 0x804   : > { %v2587_v22 = vsel %vm2559_vm14, %v2536_v13, 0.0  ;;  %v2584_v51 = vsel %vm2559_vm14, %v2535_v62, 0.0  ;;  %v2593_v12 = vsel %vm2559_vm14, %v2538_v17, 0.0  ;;  %v2590_v25 = vsel %vm2559_vm14, %v2537_v27, 0.0  ;;  %v5560_v17 = vld [vmem:[#allocation42_spill] sm:$0xff]  ;;  %v5561_v27 = vld [vmem:[#allocation41_spill] sm:$0xff] }
 0x805   : > { %2570 = vadd.xlane.f32.xlu1 %v2569_v23  ;;  %2564 = vadd.xlane.f32.xlu0 %v2563_v34  ;;  %v2599_v20 = vsel %vm2559_vm14, %v2540_v56, 0.0  ;;  %v2596_v33 = vsel %vm2559_vm14, %v2539_v39, 0.0  ;;  %v2605_v7 = vsel %vm2559_vm14, %v2542_v30, 0.0  ;;  %v2602_v26 = vsel %vm2559_vm14, %v2541_v10, 0.0  ;;  %v5553_v23 = vld [vmem:[#allocation33_spill] sm:$0xff] }
 0x806   : > { %v2544_v2 = vmul.f32 %v2524_v21, %v5546_v19  ;;  %v2543_v36 = vmul.f32 %v2524_v21, %v5547_v6  ;;  %v2546_v60 = vmul.f32 %v2524_v21, %v5548_v4  ;;  %v2545_v44 = vmul.f32 %v2524_v21, %v5549_v37 }
 0x807   : > { %v2548_v54 = vmul.f32 %v2524_v21, %v5550_v40  ;;  %v2547_v57 = vmul.f32 %v2524_v21, %v5551_v49  ;;  %v2550_v61 = vmul.f32 %v2524_v21, %v5552_v11  ;;  %v2549_v34 = vmul.f32 %v2524_v21, %v5553_v23 }
 0x808   : > { %v2611_v31 = vsel %vm2559_vm14, %v2544_v2, 0.0  ;;  %v2608_v52 = vsel %vm2559_vm14, %v2543_v36, 0.0  ;;  %v2617_v32 = vsel %vm2559_vm14, %v2546_v60, 0.0  ;;  %v2614_v45 = vsel %vm2559_vm14, %v2545_v44, 0.0 }
 0x809   : > { %2576 = vadd.xlane.f32.xlu1 %v2575_v55  ;;  %2573 = vadd.xlane.f32.xlu0 %v2572_v0  ;;  %v2623_v53 = vsel %vm2559_vm14, %v2548_v54, 0.0  ;;  %v2620_v28 = vsel %vm2559_vm14, %v2547_v57, 0.0  ;;  %v2629_v16 = vsel %vm2559_vm14, %v2550_v61, 0.0  ;;  %v2626_v59 = vsel %vm2559_vm14, %v2549_v34, 0.0  ;;  %v5555_v55 = vld [vmem:[#allocation35_spill] sm:$0xff] }
 0x80a   : > { %v2552_v38 = vmul.f32 %v2524_v21, %v5554_v9  ;;  %v2551_v0 = vmul.f32 %v2524_v21, %v5555_v55  ;;  %v2554_v46 = vmul.f32 %v2524_v21, %v5556_v43  ;;  %v2556_v62 = vmul.f32 %v2524_v21, %v5558_v48 }
 0x80b   : > { %v2558_v63 = vmul.f32 %v2524_v21, %v5560_v17  ;;  %v2557_v18 = vmul.f32 %v2524_v21, %v5561_v27  ;;  %v2660_v56 = vrot.slane %v5562_v24, %v5069_v5  ;;  %v3948_v35 = vmov 0  }
 0x80c   : > { %v2635_v41 = vsel %vm2559_vm14, %v2552_v38, 0.0  ;;  %v2632_v47 = vsel %vm2559_vm14, %v2551_v0, 0.0  ;;  %v2641_v29 = vsel %vm2559_vm14, %v2554_v46, 0.0  ;;  %3853 = vset.pattern.permute.xlu1 %v3948_v35  ;;  %3852 = vset.pattern.permute.xlu0 %v3948_v35  ;;  %v2726_v39 = vsub.s32 1, %v5065_v15 }
 0x80d   : > { %2582 = vadd.xlane.f32.xlu1 %v2581_v58  ;;  %2579 = vadd.xlane.f32.xlu0 %v2578_v50  ;;  %v5557_v58 = vld [vmem:[#allocation37_spill] sm:$0xff] }
 0x80e   : > { %v2553_v50 = vmul.f32 %v2524_v21, %v5557_v58  ;;  %v2727_v5 = vrot.slane %v5562_v24, %v2726_v39 }
 0x810   : > { %v2638_v13 = vsel %vm2559_vm14, %v2553_v50, 0.0 }
 0x811   : > { %2588 = vadd.xlane.f32.xlu1 %v2587_v22  ;;  %2585 = vadd.xlane.f32.xlu0 %v2584_v51  ;;  %v2555_v22 = vmul.f32 %v2524_v21, %v5559_v8  ;;  %v2647_v51 = vsel %vm2559_vm14, %v2556_v62, 0.0 }
 0x813   : > { %v2644_v1 = vsel %vm2559_vm14, %v2555_v22, 0.0 }
 0x815   : > { %2594 = vadd.xlane.f32.xlu1 %v2593_v12  ;;  %2591 = vadd.xlane.f32.xlu0 %v2590_v25  ;;  %v2653_v12 = vsel %vm2559_vm14, %v2558_v63, 0.0  ;;  %v2650_v25 = vsel %vm2559_vm14, %v2557_v18, 0.0  ;;  %vm3173_vm14 = vcmask 1041409  }
 0x819   : > { %2600 = vadd.xlane.f32.xlu1 %v2599_v20  ;;  %2597 = vadd.xlane.f32.xlu0 %v2596_v33 }
 0x81d   : > { %2606 = vadd.xlane.f32.xlu1 %v2605_v7  ;;  %2603 = vadd.xlane.f32.xlu0 %v2602_v26 }
 0x821   : > { %2612 = vadd.xlane.f32.xlu1 %v2611_v31  ;;  %2609 = vadd.xlane.f32.xlu0 %v2608_v52 }
 0x825   : > { %2618 = vadd.xlane.f32.xlu1 %v2617_v32  ;;  %2615 = vadd.xlane.f32.xlu0 %v2614_v45 }
 0x829   : > { %2624 = vadd.xlane.f32.xlu1 %v2623_v53  ;;  %2621 = vadd.xlane.f32.xlu0 %v2620_v28 }
 0x82d   : > { %2630 = vadd.xlane.f32.xlu1 %v2629_v16  ;;  %2627 = vadd.xlane.f32.xlu0 %v2626_v59 }
 0x831   : > { %2636 = vadd.xlane.f32.xlu1 %v2635_v41  ;;  %2633 = vadd.xlane.f32.xlu0 %v2632_v47 }
 0x835   : > { %2642 = vadd.xlane.f32.xlu1 %v2641_v29  ;;  %2639 = vadd.xlane.f32.xlu0 %v2638_v13 }
 0x839   : > { %2648 = vadd.xlane.f32.xlu1 %v2647_v51  ;;  %2645 = vadd.xlane.f32.xlu0 %v2644_v1 }
 0x83d   : > { %2654 = vadd.xlane.f32.xlu1 %v2653_v12  ;;  %2651 = vadd.xlane.f32.xlu0 %v2650_v25 }
 0x84e   : > { %2666 = vbcast.lane.b32.xlu1 %v2660_v56, 264 }
 0x852   : > { %2670 = vbcast.lane.b32.xlu1 %v2660_v56, 272 }
 0x853   : > { %2662 = vbcast.lane.b32.xlu0 %v2660_v56, 256 }
 0x856   : > { %2674 = vbcast.lane.b32.xlu1 %v2660_v56, 280 }
 0x857   : > { %2678 = vbcast.lane.b32.xlu0 %v2660_v56, 288 }
 0x85a   : > { %2682 = vbcast.lane.b32.xlu1 %v2660_v56, 296 }
 0x85b   : > { %2686 = vbcast.lane.b32.xlu0 %v2660_v56, 304 }
 0x85e   : > { %2690 = vbcast.lane.b32.xlu1 %v2660_v56, 312 }
 0x85f   : > { %2694 = vbcast.lane.b32.xlu0 %v2660_v56, 320 }
 0x862   : > { %2698 = vbcast.lane.b32.xlu1 %v2660_v56, 328 }
 0x863   : > { %2702 = vbcast.lane.b32.xlu0 %v2660_v56, 336 }
 0x866   : > { %2706 = vbcast.lane.b32.xlu1 %v2660_v56, 344 }
 0x867   : > { %2710 = vbcast.lane.b32.xlu0 %v2660_v56, 352 }
 0x86a   : > { %2714 = vbcast.lane.b32.xlu1 %v2660_v56, 360 }
 0x86b   : > { %2718 = vbcast.lane.b32.xlu0 %v2660_v56, 368 }
 0x86e   : > { %2722 = vbcast.lane.b32.xlu1 %v2660_v56, 376 }
 0x86f   : > { %2729 = vbcast.lane.b32.xlu0 %v2727_v5, 256 }
 0x872   : > { %2733 = vbcast.lane.b32.xlu1 %v2727_v5, 264 }
 0x873   : > { %2737 = vbcast.lane.b32.xlu0 %v2727_v5, 272 }
 0x876   : > { %2741 = vbcast.lane.b32.xlu1 %v2727_v5, 280 }
 0x877   : > { %2745 = vbcast.lane.b32.xlu0 %v2727_v5, 288 }
 0x87a   : > { %2749 = vbcast.lane.b32.xlu1 %v2727_v5, 296 }
 0x87b   : > { %2753 = vbcast.lane.b32.xlu0 %v2727_v5, 304 }
 0x87e   : > { %2757 = vbcast.lane.b32.xlu1 %v2727_v5, 312 }
 0x87f   : > { %2761 = vbcast.lane.b32.xlu0 %v2727_v5, 320 }
 0x882   : > { %2765 = vbcast.lane.b32.xlu1 %v2727_v5, 328 }
 0x883   : > { %2769 = vbcast.lane.b32.xlu0 %v2727_v5, 336 }
 0x886   : > { %2773 = vbcast.lane.b32.xlu1 %v2727_v5, 344 }
 0x887   : > { %2777 = vbcast.lane.b32.xlu0 %v2727_v5, 352 }
 0x88a   : > { %2781 = vbcast.lane.b32.xlu1 %v2727_v5, 360 }
 0x88b   : > { %2785 = vbcast.lane.b32.xlu0 %v2727_v5, 368 }
 0x88e   : > { %v2568_v21 = vpop.xlane.xlu1 %2567  ;;  %v2562_v20 = vpop.xlane.xlu0 %2561  ;;  %2789 = vbcast.lane.b32.xlu1 %v2727_v5, 376 }
 0x892   : > { %v2571_v33 = vpop.xlane.xlu1 %2570  ;;  %v2565_v3 = vpop.xlane.xlu0 %2564 }
 0x896   : > { %v2577_v30 = vpop.xlane.xlu1 %2576  ;;  %v2574_v14 = vpop.xlane.xlu0 %2573 }
 0x89a   : > { %v2583_v10 = vpop.xlane.xlu1 %2582  ;;  %v2580_v7 = vpop.xlane.xlu0 %2579 }
 0x89e   : > { %v2589_v26 = vpop.xlane.xlu1 %2588  ;;  %v2586_v19 = vpop.xlane.xlu0 %2585 }
 0x8a2   : > { %v2595_v2 = vpop.xlane.xlu1 %2594  ;;  %v2592_v6 = vpop.xlane.xlu0 %2591 }
 0x8a6   : > { %v5141_v36 = vpop.xlane.xlu1 %2600  ;;  %v5143_v31 = vpop.xlane.xlu0 %2597 }
 0x8aa   : > { %v5145_v52 = vpop.xlane.xlu1 %2606  ;;  %v5147_v4 = vpop.xlane.xlu0 %2603 }
 0x8ae   : > { %v5149_v60 = vpop.xlane.xlu1 %2612  ;;  %v2610_v37 = vpop.xlane.xlu0 %2609 }
 0x8b2   : > { %v5151_v44 = vpop.xlane.xlu1 %2618  ;;  %v2616_v32 = vpop.xlane.xlu0 %2615 }
 0x8b6   : > { %v5153_v45 = vpop.xlane.xlu1 %2624  ;;  %v2622_v40 = vpop.xlane.xlu0 %2621 }
 0x8ba   : > { %v5155_v54 = vpop.xlane.xlu1 %2630  ;;  %v5157_v49 = vpop.xlane.xlu0 %2627 }
 0x8be   : > { %v5159_v57 = vpop.xlane.xlu1 %2636  ;;  %v5161_v53 = vpop.xlane.xlu0 %2633 }
 0x8c2   : > { %v5163_v28 = vpop.xlane.xlu1 %2642  ;;  %v5165_v11 = vpop.xlane.xlu0 %2639 }
 0x8c6   : > { %v5167_v61 = vpop.xlane.xlu1 %2648  ;;  %v5169_v23 = vpop.xlane.xlu0 %2645 }
 0x8ca   : > { %v5171_v34 = vpop.xlane.xlu1 %2654  ;;  %v5173_v16 = vpop.xlane.xlu0 %2651 }
 0x8ce   : > { %v2667_v59 = vpop.permute.xlu1 %2666  ;;  %v2663_v9 = vpop.permute.xlu0 %2662 }
 0x8cf   : > { %v2824_v38 = vadd.f32 %v2667_v59, %v2565_v3  ;;  %v2823_v55 = vadd.f32 %v2663_v9, %v2562_v20 }
 0x8d1   : > { %2891 = vperm.xlu1 %3853, %v2824_v38   ;;  %2888 = vperm.xlu0 %3852, %v2823_v55  }
 0x8d2   : > { %v2671_v0 = vpop.permute.xlu1 %2670  ;;  %v2679_v41 = vpop.permute.xlu0 %2678 }
 0x8d3   : > { %v2825_v47 = vadd.f32 %v2671_v0, %v2568_v21  ;;  %v2827_v58 = vadd.f32 %v2679_v41, %v2574_v14 }
 0x8d5   : > { %2894 = vperm.xlu1 %3853, %v2825_v47  }
 0x8d6   : > { %v2675_v43 = vpop.permute.xlu1 %2674  ;;  %v2687_v46 = vpop.permute.xlu0 %2686 }
 0x8d7   : > { %v2826_v50 = vadd.f32 %v2675_v43, %v2571_v33  ;;  %v2829_v48 = vadd.f32 %v2687_v46, %v2580_v7 }
 0x8d9   : > { %2897 = vperm.xlu0 %3852, %v2826_v50   ;;  %2900 = vperm.xlu1 %3853, %v2827_v58  }
 0x8da   : > { %v2683_v29 = vpop.permute.xlu1 %2682  ;;  %v2695_v13 = vpop.permute.xlu0 %2694 }
 0x8db   : > { %v2828_v62 = vadd.f32 %v2683_v29, %v2577_v30  ;;  %v2831_v51 = vadd.f32 %v2695_v13, %v2586_v19 }
 0x8dd   : > { %2903 = vperm.xlu0 %3852, %v2828_v62   ;;  %2906 = vperm.xlu1 %3853, %v2829_v48  }
 0x8de   : > { %v2691_v8 = vpop.permute.xlu1 %2690  ;;  %v2703_v22 = vpop.permute.xlu0 %2702 }
 0x8df   : > { %v2830_v1 = vadd.f32 %v2691_v8, %v2583_v10  ;;  %v2833_v27 = vadd.f32 %v2703_v22, %v2592_v6 }
 0x8e1   : > { %2909 = vperm.xlu0 %3852, %v2830_v1   ;;  %2912 = vperm.xlu1 %3853, %v2831_v51   ;;  %v5209_v1 = vand.u32 127, %v2506_v42 }
 0x8e2   : > { %v2699_v17 = vpop.permute.xlu1 %2698  ;;  %v2711_v63 = vpop.permute.xlu0 %2710 }
 0x8e3   : > { %v2832_v18 = vadd.f32 %v2699_v17, %v2589_v26 }
 0x8e5   : > { %2915 = vperm.xlu0 %3852, %v2832_v18   ;;  %2918 = vperm.xlu1 %3853, %v2833_v27   ;;  %v2989_v27 = vadd.s32 4294967288, %v5209_v1  ;;  %v2996_v18 = vadd.s32 4294967280, %v5209_v1 }
 0x8e6   : > { %v2707_v12 = vpop.permute.xlu1 %2706  ;;  %v2719_v25 = vpop.permute.xlu0 %2718 }
 0x8e7   : > { %v2834_v24 = vadd.f32 %v2707_v12, %v2595_v2  ;;  %v3003_v12 = vadd.s32 4294967272, %v5209_v1  ;;  %v2999_v42 = vsub.s32 %v2996_v18, %v5065_v15  ;;  %v3066_v18 = vadd.s32 4294967200, %v5209_v1 }
 0x8e9   : > { %2921 = vperm.xlu0 %3852, %v2834_v24  }
 0x8ea   : > { %v2715_v56 = vpop.permute.xlu1 %2714  ;;  %v2730_v35 = vpop.permute.xlu0 %2729 }
 0x8eb   : > { %v2839_v39 = vadd.f32 %v2730_v35, %v2610_v37  ;;  %v2987_v35 = vsub.s32 %v5209_v1, %v5065_v15 }
 0x8ed   : > { %2936 = vperm.xlu1 %3853, %v2839_v39   ;;  %v3010_v39 = vadd.s32 4294967264, %v5209_v1 }
 0x8ee   : > { %v2723_v5 = vpop.permute.xlu1 %2722  ;;  %v2738_v21 = vpop.permute.xlu0 %2737 }
 0x8ef   : > { %v2841_v20 = vadd.f32 %v2738_v21, %v2616_v32  ;;  %v3017_v21 = vadd.s32 4294967256, %v5209_v1 }
 0x8f1   : > { %2942 = vperm.xlu1 %3853, %v2841_v20  }
 0x8f2   : > { %v2734_v33 = vpop.permute.xlu1 %2733  ;;  %v2746_v3 = vpop.permute.xlu0 %2745 }
 0x8f3   : > { %v2840_v30 = vadd.f32 %v2734_v33, %v5149_v60  ;;  %v2843_v14 = vadd.f32 %v2746_v3, %v2622_v40  ;;  %v3024_v33 = vadd.s32 4294967248, %v5209_v1 }
 0x8f5   : > { %2939 = vperm.xlu0 %3852, %v2840_v30   ;;  %2948 = vperm.xlu1 %3853, %v2843_v14  }
 0x8f6   : > { %v2742_v10 = vpop.permute.xlu1 %2741  ;;  %v2754_v7 = vpop.permute.xlu0 %2753 }
 0x8f7   : > { %v2842_v26 = vadd.f32 %v2742_v10, %v5151_v44  ;;  %v2845_v19 = vadd.f32 %v2754_v7, %v5157_v49  ;;  %v2835_v49 = vadd.f32 %v2711_v63, %v5143_v31  ;;  %v2838_v31 = vadd.f32 %v2723_v5, %v5145_v52 }
 0x8f8   : > { %v3006_v5 = vsub.s32 %v3003_v12, %v5065_v15  ;;  %v3031_v7 = vadd.s32 4294967240, %v5209_v1 }
 0x8f9   : > { %2945 = vperm.xlu0 %3852, %v2842_v26   ;;  %2954 = vperm.xlu1 %3853, %v2845_v19  }
 0x8fa   : > { %v2750_v2 = vpop.permute.xlu1 %2749  ;;  %v2762_v6 = vpop.permute.xlu0 %2761 }
 0x8fb   : > { %v2844_v37 = vadd.f32 %v2750_v2, %v5153_v45  ;;  %v2847_v32 = vadd.f32 %v2762_v6, %v5161_v53  ;;  %v2836_v53 = vadd.f32 %v2715_v56, %v5141_v36  ;;  %v2992_v56 = vsub.s32 %v2989_v27, %v5065_v15 }
 0x8fc   : > { %v3013_v2 = vsub.s32 %v3010_v39, %v5065_v15 }
 0x8fd   : > { %2951 = vperm.xlu0 %3852, %v2844_v37   ;;  %2960 = vperm.xlu1 %3853, %v2847_v32   ;;  %v3020_v37 = vsub.s32 %v3017_v21, %v5065_v15 }
 0x8fe   : > { %v2758_v60 = vpop.permute.xlu1 %2757  ;;  %v2770_v40 = vpop.permute.xlu0 %2769 }
 0x8ff   : > { %v2846_v59 = vadd.f32 %v2758_v60, %v5155_v54  ;;  %v2849_v9 = vadd.f32 %v2770_v40, %v5165_v11  ;;  %v2837_v54 = vadd.f32 %v2719_v25, %v5147_v4  ;;  %v3027_v40 = vsub.s32 %v3024_v33, %v5065_v15 }
 0x901   : > { %2957 = vperm.xlu0 %3852, %v2846_v59   ;;  %2966 = vperm.xlu1 %3853, %v2849_v9  }
 0x902   : > { %v2766_v44 = vpop.permute.xlu1 %2765  ;;  %v2778_v0 = vpop.permute.xlu0 %2777 }
 0x903   : > { %v2848_v38 = vadd.f32 %v2766_v44, %v5159_v57  ;;  %v2851_v11 = vadd.f32 %v2778_v0, %v5169_v23  ;;  %v3045_v0 = vadd.s32 4294967224, %v5209_v1 }
 0x905   : > { %2963 = vperm.xlu0 %3852, %v2848_v38   ;;  %2924 = vperm.xlu1 %3853, %v2835_v49   ;;  %v3038_v38 = vadd.s32 4294967232, %v5209_v1 }
 0x906   : > { %v2774_v45 = vpop.permute.xlu1 %2773  ;;  %v2786_v47 = vpop.permute.xlu0 %2785 }
 0x907   : > { %v2850_v55 = vadd.f32 %v2774_v45, %v5163_v28  ;;  %v2853_v36 = vadd.f32 %v2786_v47, %v5173_v16  ;;  %v3034_v45 = vsub.s32 %v3031_v7, %v5065_v15  ;;  %v3052_v47 = vadd.s32 4294967216, %v5209_v1 }
 0x909   : > { %2969 = vperm.xlu0 %3852, %v2850_v55   ;;  %2927 = vperm.xlu1 %3853, %v2836_v53  }
 0x90a   : > { %v2782_v41 = vpop.permute.xlu1 %2781 }
 0x90b   : > { %v2852_v57 = vadd.f32 %v2782_v41, %v5167_v61 }
 0x90d   : > { %2930 = vperm.xlu1 %3853, %v2837_v54   ;;  %2972 = vperm.xlu0 %3852, %v2851_v11  }
 0x90e   : > { %v2790_v28 = vpop.permute.xlu1 %2789 }
 0x90f   : > { %v2854_v43 = vadd.f32 %v2790_v28, %v5171_v34 }
 0x911   : > { %2933 = vperm.xlu1 %3853, %v2838_v31   ;;  %2975 = vperm.xlu0 %3852, %v2852_v57  }
 0x915   : > { %2978 = vperm.xlu0 %3852, %v2853_v36  }
 0x919   : > { %2981 = vperm.xlu0 %3852, %v2854_v43  }
 0x950   : > { %v2892_v4 = vpop.permute.xlu1 %2891  ;;  %v2889_v46 = vpop.permute.xlu0 %2888 }
 0x951   : > { %v2993_v14 = vrot.slane %v2892_v4, %v2992_v56  ;;  %v2988_v10 = vrot.slane %v2889_v46, %v2987_v35  ;;  %v3041_v4 = vsub.s32 %v3038_v38, %v5065_v15  ;;  %v3059_v46 = vadd.s32 4294967208, %v5209_v1 }
 0x953   : > { %v2995_v49 = vsel %vm2994_vm15, %v2993_v14, %v2988_v10  ;;  %v3062_v12 = vsub.s32 %v3059_v46, %v5065_v15  ;;  %v3069_v14 = vsub.s32 %v3066_v18, %v5065_v15 }
 0x954   : > { %v2895_v23 = vpop.permute.xlu1 %2894 }
 0x955   : > { %v3000_v19 = vrot.slane %v2895_v23, %v2999_v42 }
 0x957   : > { %v3002_v53 = vsel %vm3001_vm0, %v3000_v19, %v2995_v49 }
 0x958   : > { %v5192_v58 = vpop.permute.xlu1 %2900  ;;  %v2898_v50 = vpop.permute.xlu0 %2897 }
 0x959   : > { %v3007_v6 = vrot.slane %v2898_v50, %v3006_v5  ;;  %v3014_v55 = vrot.slane %v5192_v58, %v3013_v2  ;;  %v3048_v50 = vsub.s32 %v3045_v0, %v5065_v15 }
 0x95b   : > { %v3009_v11 = vsel %vm3008_vm1, %v3007_v6, %v3002_v53 }
 0x95c   : > { %v5194_v29 = vpop.permute.xlu1 %2906  ;;  %v5196_v52 = vpop.permute.xlu0 %2903  ;;  %v3016_v58 = vsel %vm3015_vm2, %v3014_v55, %v3009_v11 }
 0x95d   : > { %v3021_v41 = vrot.slane %v5196_v52, %v3020_v37  ;;  %v3028_v23 = vrot.slane %v5194_v29, %v3027_v40 }
 0x960   : > { %v5198_v61 = vpop.permute.xlu1 %2912  ;;  %v5200_v13 = vpop.permute.xlu0 %2909 }
 0x964   : > { %v5202_v16 = vpop.permute.xlu1 %2918  ;;  %v5204_v48 = vpop.permute.xlu0 %2915 }
 0x965   : > { %v3049_v21 = vrot.slane %v5204_v48, %v3048_v50 }
 0x968   : > { %v5206_v62 = vpop.permute.xlu0 %2921 }
 0x969   : > { %v3063_v6 = vrot.slane %v5206_v62, %v3062_v12 }
 0x96c   : > { %v2937_v34 = vpop.permute.xlu1 %2936 }
 0x96d   : > { %v3097_v26 = vrot.slane %v2937_v34, %v2987_v35  ;;  %v3023_v34 = vsel %vm3022_vm3, %v3021_v41, %v3016_v58 }
 0x96e   : > { %v3030_v35 = vsel %vm3029_vm4, %v3028_v23, %v3023_v34 }
 0x970   : > { %v2943_v8 = vpop.permute.xlu1 %2942 }
 0x971   : > { %v3106_v59 = vrot.slane %v2943_v8, %v2999_v42  ;;  %v3035_v8 = vrot.slane %v5200_v13, %v3034_v45  ;;  %v3042_v13 = vrot.slane %v5198_v61, %v3041_v4 }
 0x974   : > { %v2949_v22 = vpop.permute.xlu1 %2948  ;;  %v2940_v51 = vpop.permute.xlu0 %2939 }
 0x975   : > { %v3101_v20 = vrot.slane %v2940_v51, %v2992_v56  ;;  %v3116_v36 = vrot.slane %v2949_v22, %v3013_v2  ;;  %v3080_v56 = vadd.s32 4294967184, %v5209_v1 }
 0x977   : > { %v3102_v32 = vsel %vm2994_vm15, %v3101_v20, %v3097_v26  ;;  %v3083_v7 = vsub.s32 %v3080_v56, %v5065_v15 }
 0x978   : > { %v5211_v17 = vpop.permute.xlu1 %2954  ;;  %v2946_v63 = vpop.permute.xlu0 %2945  ;;  %v3107_v54 = vsel %vm3001_vm0, %v3106_v59, %v3102_v32 }
 0x979   : > { %v3111_v60 = vrot.slane %v2946_v63, %v3006_v5  ;;  %v3055_v63 = vsub.s32 %v3052_v47, %v5065_v15  ;;  %v3126_v27 = vrot.slane %v5211_v17, %v3027_v40  ;;  %v3087_v5 = vadd.s32 4294967176, %v5209_v1 }
 0x97a   : > { %v3037_v17 = vsel %vm3036_vm5, %v3035_v8, %v3030_v35 }
 0x97b   : > { %v3112_v31 = vsel %vm3008_vm1, %v3111_v60, %v3107_v54  ;;  %v3044_v26 = vsel %vm3043_vm6, %v3042_v13, %v3037_v17  ;;  %v3090_v19 = vsub.s32 %v3087_v5, %v5065_v15 }
 0x97c   : > { %v5216_v25 = vpop.permute.xlu1 %2960  ;;  %v2952_v24 = vpop.permute.xlu0 %2951  ;;  %v3117_v52 = vsel %vm3015_vm2, %v3116_v36, %v3112_v31  ;;  %v3051_v2 = vsel %vm3050_vm7, %v3049_v21, %v3044_v26 }
 0x97d   : > { %v3121_v57 = vrot.slane %v2952_v24, %v3020_v37  ;;  %v3073_v24 = vadd.s32 4294967192, %v5209_v1  ;;  %v3056_v1 = vrot.slane %v5202_v16, %v3055_v63 }
 0x97f   : > { %v3122_v22 = vsel %vm3022_vm3, %v3121_v57, %v3117_v52  ;;  %v3076_v10 = vsub.s32 %v3073_v24, %v5065_v15  ;;  %v3058_v15 = vsel %vm3057_vm8, %v3056_v1, %v3051_v2 }
 0x980   : > { %v5226_v3 = vpop.permute.xlu1 %2966  ;;  %v5228_v30 = vpop.permute.xlu0 %2957  ;;  %v3127_v42 = vsel %vm3029_vm4, %v3126_v27, %v3122_v22  ;;  %v3065_v53 = vsel %vm3064_vm9, %v3063_v6, %v3058_v15 }
 0x981   : > { %v3131_v51 = vrot.slane %v5228_v30, %v3034_v45  ;;  %v3136_v30 = vrot.slane %v5216_v25, %v3041_v4  ;;  %v3146_v32 = vrot.slane %v5226_v3, %v3055_v63 }
 0x983   : > { %v3132_v20 = vsel %vm3036_vm5, %v3131_v51, %v3127_v42 }
 0x984   : > { %v5234_v9 = vpop.permute.xlu1 %2924  ;;  %v2964_v44 = vpop.permute.xlu0 %2963  ;;  %v3137_v48 = vsel %vm3043_vm6, %v3136_v30, %v3132_v20 }
 0x985   : > { %v3141_v33 = vrot.slane %v2964_v44, %v3048_v50  ;;  %v3070_v60 = vrot.slane %v5234_v9, %v3069_v14 }
 0x987   : > { %v3142_v25 = vsel %vm3050_vm7, %v3141_v33, %v3137_v48  ;;  %v3072_v9 = vsel %vm3071_vm10, %v3070_v60, %v3065_v53 }
 0x988   : > { %v5244_v28 = vpop.permute.xlu1 %2927  ;;  %v2970_v43 = vpop.permute.xlu0 %2969  ;;  %v3147_v38 = vsel %vm3057_vm8, %v3146_v32, %v3142_v25 }
 0x989   : > { %v3151_v37 = vrot.slane %v2970_v43, %v3062_v12  ;;  %v3077_v16 = vrot.slane %v5244_v28, %v3076_v10 }
 0x98b   : > { %v3152_v55 = vsel %vm3064_vm9, %v3151_v37, %v3147_v38  ;;  %v3079_v11 = vsel %vm3078_vm11, %v3077_v16, %v3072_v9 }
 0x98c   : > { %v2973_v29 = vpop.permute.xlu0 %2972  ;;  %v2931_v39 = vpop.permute.xlu1 %2930 }
 0x98d   : > { %v3156_v40 = vrot.slane %v2973_v29, %v3069_v14  ;;  %v3084_v62 = vrot.slane %v2931_v39, %v3083_v7 }
 0x98f   : > { %v3157_v0 = vsel %vm3071_vm10, %v3156_v40, %v3152_v55  ;;  %v3086_v57 = vsel %vm3085_vm12, %v3084_v62, %v3079_v11 }
 0x990   : > { %v2976_v61 = vpop.permute.xlu0 %2975  ;;  %v2934_v59 = vpop.permute.xlu1 %2933 }
 0x991   : > { %v3161_v49 = vrot.slane %v2976_v61, %v3076_v10  ;;  %v3091_v3 = vrot.slane %v2934_v59, %v3090_v19 }
 0x993   : > { %v3162_v41 = vsel %vm3078_vm11, %v3161_v49, %v3157_v0  ;;  %v3093_v36 = vsel %vm3092_vm13, %v3091_v3, %v3086_v57 }
 0x994   : > { %v2979_v44 = vpop.permute.xlu0 %2978 }
 0x995   : > { %v3166_v45 = vrot.slane %v2979_v44, %v3083_v7 }
 0x997   : > { %v3167_v47 = vsel %vm3085_vm12, %v3166_v45, %v3162_v41 }
 0x998   : > { %v2982_v54 = vpop.permute.xlu0 %2981 }
 0x999   : > { %v3171_v31 = vrot.slane %v2982_v54, %v3090_v19 }
 0x99b   : > { %v3172_v28 = vsel %vm3092_vm13, %v3171_v31, %v3167_v47 }
 0x99c   : > { %v3174_v43 = vsel %vm3173_vm14, %v3172_v28, %v3093_v36 }
 0x99d   : > { %3176 = vst [vmem:[%s4237_s25] sm:$0x3] %v3174_v43 }
 0x99e PF: > { %s3360_s16 = sshll.u32 %s3924_s20, 5  ;;  %s3193_s21 = sshll.u32 %s4237_s25, 4  ;;  %s3194_s21 = int_to_ptr.vmem [resolvable:$true] %s3193_s21 }
 0x99f   : > { %s5288_s24 = scalar_lea.hbm %s5343_s11, %s3360_s16  ;;  %s5563_s12 = sand.u32 1, %s3916_s18  }
 0x9a0   : > { %s3178_s28 = scalar_lea.sflag [#allocation7], %s5563_s12  ;;  %s3854_s13 = scalar_lea.vmem %s3194_s21, 32 }
 0x9a1   : > { %p3855_p1 = scmp.ne.s32.totalorder %s3194_s21, %s3854_s13  ;;  %s3949_s14 = smov [#allocation6]  }
 0x9a2   : > { %s3858_s15 = sshll.u32 %s3949_s14, 4  ;;  %s3859_s15 = int_to_ptr.vmem [resolvable:$false] %s3858_s15 }
 0x9a3   : > { %p3856_p2 = pnand %p3855_p1, %p4050_p4  ;;  %s3860_s0 = scalar_lea.vmem %s3859_s15, 64 }
 0x9a4   : > { %p3861_p5 = scmp.lt.s32.totalorder %s3194_s21, %s3859_s15  ;;  %p3862_p6 = scmp.lt.s32.totalorder %s3860_s0, %s3854_s13 }
 0x9a5   : > { %p3857_p3 = pneg %p3856_p2 }
 0x9a6   : > { %p3863_p7 = por %p3862_p6, %p3861_p5 }
 0x9a8   : > { %p3864_p9 = pnand %p3863_p7, %p3857_p3 }
 0x9aa   : > { %3867 = shalt.err (!%p3864_p9)
}
 0x9ab   : > { %s3868_s20 = scalar_lea.hbm %s5288_s24, 32  ;;  %s3872_s23 = scalar_lea.hbm %s5343_s11, 64 }
 0x9ac   : > { %p3869_p10 = scmp.ne.s32.totalorder %s5288_s24, %s3868_s20  ;;  %p3873_p13 = scmp.lt.u32.totalorder %s5288_s24, %s5343_s11 }
 0x9ad   : > { %p3874_p0 = scmp.lt.u32.totalorder %s3872_s23, %s3868_s20  ;;  %p3876_p2 = scmp.lt.u32.totalorder %s3868_s20, %s5288_s24 }
 0x9ae   : > { %p3870_p11 = pnand %p3869_p10, %p4050_p4 }
 0x9af   : > { %p3875_p1 = por %p3874_p0, %p3873_p13 }
 0x9b0   : > { %p3871_p12 = pneg %p3870_p11 }
 0x9b1   : > { %p3877_p3 = por %p3876_p2, %p3875_p1 }
 0x9b3   : > { %p3878_p5 = pnand %p3877_p3, %p3871_p12 }
 0x9b5   : > { %3881 = shalt.err (!%p3878_p5)
}
 0x9b6   : > { %3701 = dma.vmem_to_hbm [thread:$0]  (%p4050_p4), %s3194_s21, 32, %s5288_s24, %s3178_s28  }
 0x9b7 PF: > { %p3707_p6 = scmp.ge.s32.totalorder %s3932_s22, 2  ;;  %s3205_s0 = sand.u32 1, %s3912_s17  }
 0x9b8   : > { %s3206_s13 = scalar_lea.sflag [#allocation7], %s3205_s0 }
 0x9b9   : > { %p3704_p7 = pnand %p3707_p6, %p4057_p8 }
 0x9bb   : > { %3907 = dma.done.wait (!%p3704_p7), %s3206_s13, 32  }
 0x9bc   : > { %3909 = vsyncadd (!%p3704_p7), %s3206_s13, 4294967264  ;;  %s24_s22 = sadd.s32 1, %s3932_s22   ;;  %s5564_s20 = sld [smem:[#allocation9_spill]] }
 0x9bd   : > { %p21_p9 = scmp.ge.s32.totalorder %s24_s22, 4   ;;  %s5565_s21 = sld [smem:[#allocation10_spill]] }
 0x9be   : > { %s5566_s17 = smov %s3916_s18  ;;  %s5567_s18 = smov %s3920_s19 }
 0x9bf   : > { %s5568_s19 = smov %s4063_s30  ;;  %23 = sbr.rel (!%p21_p9) target bundleno = 6 (0x6), region = 129 }
 0x9c6   :  { %3211 = vsyncpa [#allocation7], 1 }
 0x9c7   :  { %3213 = vsyncpa [#allocation7 + $0x1], 1 }

</bundles_post_ra>
